<compile_context>
chip_gen: v5e
topology: v5e:2x2
jax: 0.10.0
libtpu: 0.0.40
codegen_flags: <defaults>
</compile_context>

<pallas_src>
import jax
import jax.numpy as jnp
from jax.experimental import pallas as pl
from jax.experimental.pallas import tpu as pltpu

_LANE = 128


def _softplus(x):
    # numerically stable softplus = log(1 + exp(x)); lowers to EUP (free slot
    # under an MXU/DMA-bound kernel), keep in f32.
    return jnp.logaddexp(x, 0.0)


def _round_up(n, m):
    return ((n + m - 1) // m) * m


def _pad2(a, rows, cols):
    return jnp.pad(a, ((0, rows - a.shape[0]), (0, cols - a.shape[1])))


def mlp_kernel(target_ref, x_ref, w1_ref, b1_ref, w2_ref, b2_ref, w3_ref, b3_ref, o_ref):
    # layer 1: (TB, n_in_p) @ (n_in_p, n_h_p), f32 accumulate
    h = jnp.dot(x_ref[...], w1_ref[...], preferred_element_type=jnp.float32)
    h = _softplus(h + b1_ref[...])                       # f32 bias-add + softplus
    # layer 2
    h = jnp.dot(h.astype(w2_ref.dtype), w2_ref[...], preferred_element_type=jnp.float32)
    h = _softplus(h + b2_ref[...])
    # layer 3 (no activation)
    out = jnp.dot(h.astype(w3_ref.dtype), w3_ref[...], preferred_element_type=jnp.float32)
    out = out + b3_ref[...]

    # fused perfect-intervention: zero the target column (target = -1 => no-op)
    tgt = target_ref[0]
    col = jax.lax.broadcasted_iota(jnp.int32, out.shape, dimension=1)
    out = jnp.where(col == tgt, 0.0, out)

    o_ref[...] = out.astype(o_ref.dtype)


def mlp_forward(x, params, target=None, *, block_b=256, use_bf16=True):
    """Forward pass equivalent to MLP.forward(t, x, target) with time_invariant=True.

    x: (batch, n_inputs) float32
    params: dict with w1 (n_in, n_h), b1 (n_h,), w2 (n_h, n_h), b2 (n_h,),
            w3 (n_h, n_in), b3 (n_in,)  -- weights already transposed to (in, out).
    target: optional int column to zero in the output (perfect intervention).
    """
    B, n_in = x.shape
    n_h = params["w1"].shape[1]

    # pad feature dims to lane multiples, batch to a multiple of the batch tile
    n_in_p = _round_up(n_in, _LANE)
    n_h_p = _round_up(n_h, _LANE)
    tb = block_b
    b_p = _round_up(B, tb)

    wdt = jnp.bfloat16 if use_bf16 else jnp.float32

    # zero-padding is exact: padded weight rows/cols are 0, so padded hidden
    # lanes (which hold softplus(0)=log 2) are multiplied by zero rows downstream.
    w1 = _pad2(params["w1"], n_in_p, n_h_p).astype(wdt)
    w2 = _pad2(params["w2"], n_h_p, n_h_p).astype(wdt)
    w3 = _pad2(params["w3"], n_h_p, n_in_p).astype(wdt)
    b1 = jnp.pad(params["b1"], (0, n_h_p - n_h)).reshape(1, n_h_p).astype(jnp.float32)
    b2 = jnp.pad(params["b2"], (0, n_h_p - n_h)).reshape(1, n_h_p).astype(jnp.float32)
    b3 = jnp.pad(params["b3"], (0, n_in_p - n_in)).reshape(1, n_in_p).astype(jnp.float32)
    x_p = _pad2(x, b_p, n_in_p).astype(wdt)

    tgt = jnp.array([-1 if target is None else int(target)], jnp.int32)

    out = pl.pallas_call(
        mlp_kernel,
        out_shape=jax.ShapeDtypeStruct((b_p, n_in_p), jnp.float32),
        grid_spec=pltpu.PrefetchScalarGridSpec(
            num_scalar_prefetch=1,
            grid=(b_p // tb,),
            in_specs=[
                # x tiled over the batch axis (double-buffered by the pipeline)
                pl.BlockSpec((tb, n_in_p), lambda i, tgt_ref: (i, 0)),
                # weights/biases: constant index_map -> stay resident in VMEM
                pl.BlockSpec((n_in_p, n_h_p), lambda i, tgt_ref: (0, 0)),
                pl.BlockSpec((1, n_h_p), lambda i, tgt_ref: (0, 0)),
                pl.BlockSpec((n_h_p, n_h_p), lambda i, tgt_ref: (0, 0)),
                pl.BlockSpec((1, n_h_p), lambda i, tgt_ref: (0, 0)),
                pl.BlockSpec((n_h_p, n_in_p), lambda i, tgt_ref: (0, 0)),
                pl.BlockSpec((1, n_in_p), lambda i, tgt_ref: (0, 0)),
            ],
            out_specs=pl.BlockSpec((tb, n_in_p), lambda i, tgt_ref: (i, 0)),
        ),
        compiler_params=pltpu.CompilerParams(
            dimension_semantics=("parallel",),   # batch tiles are independent (v7x 2 TCs)
        ),
    )(tgt, x_p, w1, b1, w2, b2, w3, b3)

    return out[:B, :n_in]


def init_mlp_params(key, n_inputs, n_hidden, n_layers=3, dtype=jnp.float32):
    """Deterministic init mimicking PyTorch nn.Linear default (uniform +-1/sqrt(fan_in)).

    Returns weights already transposed to (in, out)."""
    assert n_layers == 3, "this synthetic example fuses exactly 3 layers"
    dims = [(n_inputs, n_hidden), (n_hidden, n_hidden), (n_hidden, n_inputs)]
    params = {}
    for i, (fan_in, fan_out) in enumerate(dims, start=1):
        key, kw, kb = jax.random.split(key, 3)
        bound = 1.0 / jnp.sqrt(fan_in)
        params[f"w{i}"] = jax.random.uniform(
            kw, (fan_in, fan_out), dtype, minval=-bound, maxval=bound
        )
        params[f"b{i}"] = jax.random.uniform(
            kb, (fan_out,), dtype, minval=-bound, maxval=bound
        )
    return params


def _ref(x, p):
    h = jnp.logaddexp(x @ p["w1"] + p["b1"], 0.0)
    h = jnp.logaddexp(h @ p["w2"] + p["b2"], 0.0)
    return h @ p["w3"] + p["b3"]


if __name__ == "__main__":
    key = jax.random.PRNGKey(0)
    batch, n_inputs, n_hidden = 8, 4, 32

    key, kx = jax.random.split(key)
    x = jax.random.normal(kx, (batch, n_inputs), jnp.float32)
    t = jnp.zeros((batch, 1), jnp.float32)  # unused (time_invariant=True)

    params = init_mlp_params(key, n_inputs, n_hidden, n_layers=3)
    expected = _ref(x, params)

    # exact f32 path
    out_f32 = jax.block_until_ready(mlp_forward(x, params, use_bf16=False))
    assert out_f32.shape == (batch, n_inputs)
    assert jnp.allclose(out_f32, expected, atol=1e-5, rtol=1e-5)

    # bf16-MXU / f32-accumulate path (default)
    out_bf16 = jax.block_until_ready(mlp_forward(x, params, use_bf16=True))
    assert jnp.allclose(out_bf16, expected, atol=3e-2, rtol=3e-2)

    # fused perfect-intervention (target column zeroing inside the kernel)
    out_tgt = jax.block_until_ready(mlp_forward(x, params, target=2, use_bf16=False))
    assert jnp.allclose(out_tgt[:, 2], 0.0)
    assert jnp.allclose(
        out_tgt, expected.at[:, 2].set(0.0), atol=1e-5, rtol=1e-5
    )

    print("KERNEL_OK")
</pallas_src>

<mosaic_0001>
module attributes {stable_mosaic.version = 11 : i64} {
  func.func @mlp_kernel(%arg0: i32, %arg1: memref<1xi32, #tpu.memory_space<smem>>, %arg2: memref<256x128xf32, #tpu.memory_space<vmem>>, %arg3: memref<128x128xf32, #tpu.memory_space<vmem>>, %arg4: memref<1x128xf32, #tpu.memory_space<vmem>>, %arg5: memref<128x128xf32, #tpu.memory_space<vmem>>, %arg6: memref<1x128xf32, #tpu.memory_space<vmem>>, %arg7: memref<128x128xf32, #tpu.memory_space<vmem>>, %arg8: memref<1x128xf32, #tpu.memory_space<vmem>>, %arg9: memref<256x128xf32, #tpu.memory_space<vmem>>) attributes {dimension_semantics = [#tpu.dimension_semantics<parallel>], iteration_bounds = array<i64: 1>, scalar_prefetch = 1 : i64, scratch_operands = 0 : i64, tpu.core_type = #tpu.core_type<tc>, window_params = [{transform_indices = @transform_0, window_bounds = array<i64: 256, 128>}, {pipeline_mode = #tpu.pipeline_mode<synchronous>, transform_indices = @transform_1, window_bounds = array<i64: 128, 128>}, {pipeline_mode = #tpu.pipeline_mode<synchronous>, transform_indices = @transform_2, window_bounds = array<i64: 1, 128>}, {pipeline_mode = #tpu.pipeline_mode<synchronous>, transform_indices = @transform_3, window_bounds = array<i64: 128, 128>}, {pipeline_mode = #tpu.pipeline_mode<synchronous>, transform_indices = @transform_4, window_bounds = array<i64: 1, 128>}, {pipeline_mode = #tpu.pipeline_mode<synchronous>, transform_indices = @transform_5, window_bounds = array<i64: 128, 128>}, {pipeline_mode = #tpu.pipeline_mode<synchronous>, transform_indices = @transform_6, window_bounds = array<i64: 1, 128>}, {transform_indices = @transform_7, window_bounds = array<i64: 256, 128>}]} {
    %c0 = arith.constant 0 : index
    %c0_0 = arith.constant 0 : index
    %0 = vector.load %arg2[%c0, %c0_0] : memref<256x128xf32, #tpu.memory_space<vmem>>, vector<256x128xf32>
    %c0_1 = arith.constant 0 : index
    %c0_2 = arith.constant 0 : index
    %1 = vector.load %arg3[%c0_1, %c0_2] : memref<128x128xf32, #tpu.memory_space<vmem>>, vector<128x128xf32>
    %cst = arith.constant dense<0.000000e+00> : vector<256x128xf32>
    %2 = tpu.matmul %0, %1, %cst {dimension_numbers = #tpu.dot_dimension_numbers<[1], [0], [0], [1], [0, 0, 1, 1], [], []>} : vector<256x128xf32>, vector<128x128xf32>, vector<256x128xf32> -> vector<256x128xf32>
    %c0_3 = arith.constant 0 : index
    %c0_4 = arith.constant 0 : index
    %3 = vector.load %arg4[%c0_3, %c0_4] : memref<1x128xf32, #tpu.memory_space<vmem>>, vector<1x128xf32>
    %4 = vector.broadcast %3 : vector<1x128xf32> to vector<256x128xf32>
    %5 = arith.addf %2, %4 : vector<256x128xf32>
    %cst_5 = arith.constant 0.000000e+00 : f32
    %6 = vector.broadcast %cst_5 : f32 to vector<256x128xf32>
    %7 = arith.maximumf %5, %6 : vector<256x128xf32>
    %8 = vector.broadcast %cst_5 : f32 to vector<256x128xf32>
    %9 = arith.subf %5, %8 : vector<256x128xf32>
    %10 = arith.cmpf one, %9, %9 : vector<256x128xf32>
    %11 = vector.broadcast %cst_5 : f32 to vector<256x128xf32>
    %12 = arith.addf %5, %11 : vector<256x128xf32>
    %13 = math.absf %9 : vector<256x128xf32>
    %cst_6 = arith.constant 0.000000e+00 : f32
    %14 = vector.broadcast %cst_6 : f32 to vector<256x128xf32>
    %15 = arith.subf %14, %13 : vector<256x128xf32>
    %16 = math.exp %15 : vector<256x128xf32>
    %17 = math.log1p %16 : vector<256x128xf32>
    %18 = arith.addf %7, %17 : vector<256x128xf32>
    %19 = arith.select %10, %12, %18 : vector<256x128xi1>, vector<256x128xf32>
    %c0_7 = arith.constant 0 : index
    %c0_8 = arith.constant 0 : index
    %20 = vector.load %arg5[%c0_7, %c0_8] : memref<128x128xf32, #tpu.memory_space<vmem>>, vector<128x128xf32>
    %cst_9 = arith.constant dense<0.000000e+00> : vector<256x128xf32>
    %21 = tpu.matmul %19, %20, %cst_9 {dimension_numbers = #tpu.dot_dimension_numbers<[1], [0], [0], [1], [0, 0, 1, 1], [], []>} : vector<256x128xf32>, vector<128x128xf32>, vector<256x128xf32> -> vector<256x128xf32>
    %c0_10 = arith.constant 0 : index
    %c0_11 = arith.constant 0 : index
    %22 = vector.load %arg6[%c0_10, %c0_11] : memref<1x128xf32, #tpu.memory_space<vmem>>, vector<1x128xf32>
    %23 = vector.broadcast %22 : vector<1x128xf32> to vector<256x128xf32>
    %24 = arith.addf %21, %23 : vector<256x128xf32>
    %cst_12 = arith.constant 0.000000e+00 : f32
    %25 = vector.broadcast %cst_12 : f32 to vector<256x128xf32>
    %26 = arith.maximumf %24, %25 : vector<256x128xf32>
    %27 = vector.broadcast %cst_12 : f32 to vector<256x128xf32>
    %28 = arith.subf %24, %27 : vector<256x128xf32>
    %29 = arith.cmpf one, %28, %28 : vector<256x128xf32>
    %30 = vector.broadcast %cst_12 : f32 to vector<256x128xf32>
    %31 = arith.addf %24, %30 : vector<256x128xf32>
    %32 = math.absf %28 : vector<256x128xf32>
    %cst_13 = arith.constant 0.000000e+00 : f32
    %33 = vector.broadcast %cst_13 : f32 to vector<256x128xf32>
    %34 = arith.subf %33, %32 : vector<256x128xf32>
    %35 = math.exp %34 : vector<256x128xf32>
    %36 = math.log1p %35 : vector<256x128xf32>
    %37 = arith.addf %26, %36 : vector<256x128xf32>
    %38 = arith.select %29, %31, %37 : vector<256x128xi1>, vector<256x128xf32>
    %c0_14 = arith.constant 0 : index
    %c0_15 = arith.constant 0 : index
    %39 = vector.load %arg7[%c0_14, %c0_15] : memref<128x128xf32, #tpu.memory_space<vmem>>, vector<128x128xf32>
    %cst_16 = arith.constant dense<0.000000e+00> : vector<256x128xf32>
    %40 = tpu.matmul %38, %39, %cst_16 {dimension_numbers = #tpu.dot_dimension_numbers<[1], [0], [0], [1], [0, 0, 1, 1], [], []>} : vector<256x128xf32>, vector<128x128xf32>, vector<256x128xf32> -> vector<256x128xf32>
    %c0_17 = arith.constant 0 : index
    %c0_18 = arith.constant 0 : index
    %41 = vector.load %arg8[%c0_17, %c0_18] : memref<1x128xf32, #tpu.memory_space<vmem>>, vector<1x128xf32>
    %42 = vector.broadcast %41 : vector<1x128xf32> to vector<256x128xf32>
    %43 = arith.addf %40, %42 : vector<256x128xf32>
    %c0_19 = arith.constant 0 : index
    %44 = memref.load %arg1[%c0_19] : memref<1xi32, #tpu.memory_space<smem>>
    %45 = tpu.iota {dimensions = array<i32: 1>} : vector<256x128xi32>
    %46 = vector.broadcast %44 : i32 to vector<256x128xi32>
    %47 = arith.cmpi eq, %45, %46 : vector<256x128xi32>
    %cst_20 = arith.constant 0.000000e+00 : f32
    %48 = vector.broadcast %cst_20 : f32 to vector<256x128xf32>
    %49 = arith.select %47, %48, %43 : vector<256x128xi1>, vector<256x128xf32>
    %c0_21 = arith.constant 0 : index
    %c0_22 = arith.constant 0 : index
    %50 = vector.load %arg9[%c0_21, %c0_22] : memref<256x128xf32, #tpu.memory_space<vmem>>, vector<256x128xf32>
    tpu.vector_store %arg9[%c0_21, %c0_22], %49 {strides = array<i32>} : memref<256x128xf32, #tpu.memory_space<vmem>>, vector<256x128xf32>,
    return
  }
  func.func @transform_0(%arg0: i32, %arg1: memref<1xi32, #tpu.memory_space<smem>>) -> (i32, i32) {
    %c0_i32 = arith.constant 0 : i32
    %c0_i32_0 = arith.constant 0 : i32
    return %arg0, %c0_i32 : i32, i32
  }
  func.func @transform_1(%arg0: i32, %arg1: memref<1xi32, #tpu.memory_space<smem>>) -> (i32, i32) {
    %c0_i32 = arith.constant 0 : i32
    %c0_i32_0 = arith.constant 0 : i32
    %c0_i32_1 = arith.constant 0 : i32
    return %c0_i32, %c0_i32_0 : i32, i32
  }
  func.func @transform_2(%arg0: i32, %arg1: memref<1xi32, #tpu.memory_space<smem>>) -> (i32, i32) {
    %c0_i32 = arith.constant 0 : i32
    %c0_i32_0 = arith.constant 0 : i32
    %c0_i32_1 = arith.constant 0 : i32
    return %c0_i32, %c0_i32_0 : i32, i32
  }
  func.func @transform_3(%arg0: i32, %arg1: memref<1xi32, #tpu.memory_space<smem>>) -> (i32, i32) {
    %c0_i32 = arith.constant 0 : i32
    %c0_i32_0 = arith.constant 0 : i32
    %c0_i32_1 = arith.constant 0 : i32
    return %c0_i32, %c0_i32_0 : i32, i32
  }
  func.func @transform_4(%arg0: i32, %arg1: memref<1xi32, #tpu.memory_space<smem>>) -> (i32, i32) {
    %c0_i32 = arith.constant 0 : i32
    %c0_i32_0 = arith.constant 0 : i32
    %c0_i32_1 = arith.constant 0 : i32
    return %c0_i32, %c0_i32_0 : i32, i32
  }
  func.func @transform_5(%arg0: i32, %arg1: memref<1xi32, #tpu.memory_space<smem>>) -> (i32, i32) {
    %c0_i32 = arith.constant 0 : i32
    %c0_i32_0 = arith.constant 0 : i32
    %c0_i32_1 = arith.constant 0 : i32
    return %c0_i32, %c0_i32_0 : i32, i32
  }
  func.func @transform_6(%arg0: i32, %arg1: memref<1xi32, #tpu.memory_space<smem>>) -> (i32, i32) {
    %c0_i32 = arith.constant 0 : i32
    %c0_i32_0 = arith.constant 0 : i32
    %c0_i32_1 = arith.constant 0 : i32
    return %c0_i32, %c0_i32_0 : i32, i32
  }
  func.func @transform_7(%arg0: i32, %arg1: memref<1xi32, #tpu.memory_space<smem>>) -> (i32, i32) {
    %c0_i32 = arith.constant 0 : i32
    %c0_i32_0 = arith.constant 0 : i32
    return %arg0, %c0_i32 : i32, i32
  }
}

</mosaic_0001>

<bundles_post_ra>
// kernel: tpu_custom_call.1
= control target key start
LH: loop header
LB: loop body
LE: loop exit
PB: predicated region body
PF: predicated region fallthrough
CT: control target
= control target key end

     0   :  { %14 = vsyncpa [#allocation5], 0  ;;  %s3216_s0 = inlined_call_operand.<no memory space> [shape: s32[1], index: 0, kind: input, shape index: {}]   ;;  %s3217_s1 = inlined_call_operand.hbm [shape: f32[256,128], index: 1, kind: input, shape index: {}]   ;;  %s3218_s2 = inlined_call_operand.hbm [shape: f32[128,128], index: 2, kind: input, shape index: {}]   ;;  %s3219_s3 = inlined_call_operand.vmem [shape: f32[1,128], index: 3, kind: input, shape index: {}]   ;;  %s3220_s4 = inlined_call_operand.hbm [shape: f32[128,128], index: 4, kind: input, shape index: {}]   ;;  %s3221_s5 = inlined_call_operand.vmem [shape: f32[1,128], index: 5, kind: input, shape index: {}]   ;;  %s3222_s6 = inlined_call_operand.hbm [shape: f32[128,128], index: 6, kind: input, shape index: {}]   ;;  %s3223_s7 = inlined_call_operand.vmem [shape: f32[1,128], index: 7, kind: input, shape index: {}]   ;;  %s3224_s8 = inlined_call_operand.hbm [shape: f32[256,128], index: 8, kind: output, shape index: {}]  }
   0x1   :  { %15 = vsyncpa [#allocation8], 0 }
   0x2   :  { %16 = vsyncpa [#allocation11], 0 }
   0x3   :  { %17 = vsyncpa [#allocation6], 0  ;;  %s35_s29 = sshll.u32 %s3218_s2, 4  ;;  %s2209_s30 = smov [#allocation7]   ;;  %s36_s29 = int_to_ptr.hbm [resolvable:$true] %s35_s29 }
   0x4   :  { %s37_s9 = sshll.u32 %s2209_s30, 4  ;;  %s22_s12 = sshll.u32 %s3217_s1, 4  ;;  %s38_s9 = int_to_ptr.vmem [resolvable:$true] %s37_s9  ;;  %s23_s12 = int_to_ptr.hbm [resolvable:$true] %s22_s12 }
   0x5   :  { %s2210_s13 = smov 128   ;;  %s2211_s14 = smov 8  }
   0x6   :  { %43 = dma.hbm_to_vmem [thread:$0]  %s36_s29, 2048, %s38_s9, [#allocation8], %s2210_s13, %s2210_s13, %s2211_s14  }
   0x7   :  { %s2212_s15 = smov [#allocation4]   ;;  %s50_s2 = sshll.u32 %s3220_s4, 4  ;;  %s51_s2 = int_to_ptr.hbm [resolvable:$true] %s50_s2 }
   0x8   :  { %s24_s16 = sshll.u32 %s2212_s15, 4  ;;  %s65_s20 = sshll.u32 %s3222_s6, 4  ;;  %s25_s16 = int_to_ptr.vmem [resolvable:$true] %s24_s16  ;;  %s66_s20 = int_to_ptr.hbm [resolvable:$true] %s65_s20 }
   0x9   :  { %30 = dma.hbm_to_vmem [thread:$0]  %s23_s12, 4096, %s25_s16, [#allocation5], %s2210_s13, %s2210_s13, %s2211_s14  }
   0xa   :  { %s2213_s21 = smov [#allocation9]   ;;  %s2214_s23 = smov [#allocation10]  }
   0xb   :  { %s52_s22 = sshll.u32 %s2213_s21, 4  ;;  %s67_s4 = sshll.u32 %s2214_s23, 4  ;;  %s53_s22 = int_to_ptr.vmem [resolvable:$true] %s52_s22  ;;  %s68_s4 = int_to_ptr.vmem [resolvable:$true] %s67_s4 }
   0xc   :  { %58 = dma.hbm_to_vmem [thread:$0]  %s51_s2, 2048, %s53_s22, [#allocation8], %s2210_s13, %s2210_s13, %s2211_s14  }
   0xd   :  { %73 = dma.hbm_to_vmem [thread:$0]  %s66_s20, 2048, %s68_s4, [#allocation11], %s2210_s13, %s2210_s13, %s2211_s14  }
   0xe   :  { %2201 = dma.done.wait [#allocation5], 4096  }
   0xf   :  { %2202 = vsyncadd [#allocation5], 4294963200 }
  0x10   :  { %2203 = dma.done.wait [#allocation8], 4096  }
  0x11   :  { %2204 = vsyncadd [#allocation8], 4294963200 }
  0x12   :  { %2205 = dma.done.wait [#allocation11], 2048  }
  0x13   :  { %2206 = vsyncadd [#allocation11], 4294965248  ;;  %v139_v0 = vld [vmem:[#allocation7 + $0x78] sm:$0xff]  ;;  %v138_v1 = vld [vmem:[#allocation7 + $0x70] sm:$0xff]  ;;  %s1750_s15 = sshll.u32 %s3224_s8, 4  ;;  %s1751_s15 = int_to_ptr.hbm [resolvable:$true] %s1750_s15 }
  0x14   :  { %144 = vmatpush.msra.mxu0 %v139_v0  ;;  %1765 = vmatpush.msra.mxu3 %v139_v0  ;;  %v137_v2 = vld [vmem:[#allocation7 + $0x68] sm:$0xff]  ;;  %v136_v3 = vld [vmem:[#allocation7 + $0x60] sm:$0xff]  ;;  %v135_v4 = vld [vmem:[#allocation7 + $0x58] sm:$0xff] }
  0x15   :  { %v134_v5 = vld [vmem:[#allocation7 + $0x50] sm:$0xff]  ;;  %v133_v6 = vld [vmem:[#allocation7 + $0x48] sm:$0xff]  ;;  %v132_v7 = vld [vmem:[#allocation7 + $0x40] sm:$0xff] }
  0x16   :  { %145 = vmatpush.msra.mxu0 %v138_v1  ;;  %1766 = vmatpush.msra.mxu3 %v138_v1  ;;  %v131_v8 = vld [vmem:[#allocation7 + $0x38] sm:$0xff]  ;;  %v130_v9 = vld [vmem:[#allocation7 + $0x30] sm:$0xff]  ;;  %v129_v10 = vld [vmem:[#allocation7 + $0x28] sm:$0xff] }
  0x17   :  { %v128_v11 = vld [vmem:[#allocation7 + $0x20] sm:$0xff]  ;;  %v127_v12 = vld [vmem:[#allocation7 + $0x18] sm:$0xff]  ;;  %v126_v13 = vld [vmem:[#allocation7 + $0x10] sm:$0xff] }
  0x18   :  { %146 = vmatpush.msra.mxu0 %v137_v2  ;;  %1767 = vmatpush.msra.mxu3 %v137_v2  ;;  %v125_v14 = vld [vmem:[#allocation7 + $0x8] sm:$0xff]  ;;  %v124_v15 = vld [vmem:[#allocation7] sm:$0xff]  ;;  %v94_v18 = vld [vmem:[#allocation4 + $0x10] sm:$0xff] }
  0x19   :  { %v92_v16 = vld [vmem:[#allocation4] sm:$0xff]  ;;  %v93_v17 = vld [vmem:[#allocation4 + $0x8] sm:$0xff]  ;;  %v95_v19 = vld [vmem:[#allocation4 + $0x18] sm:$0xff] }
  0x1a   :  { %147 = vmatpush.msra.mxu0 %v136_v3  ;;  %1768 = vmatpush.msra.mxu3 %v136_v3  ;;  %v116_v20 = vld [vmem:[#allocation4 + $0xc0] sm:$0xff]  ;;  %v117_v22 = vld [vmem:[#allocation4 + $0xc8] sm:$0xff]  ;;  %v118_v24 = vld [vmem:[#allocation4 + $0xd0] sm:$0xff] }
  0x1b   :  { %v96_v21 = vld [vmem:[#allocation4 + $0x20] sm:$0xff]  ;;  %v97_v23 = vld [vmem:[#allocation4 + $0x28] sm:$0xff]  ;;  %v98_v25 = vld [vmem:[#allocation4 + $0x30] sm:$0xff] }
  0x1c   :  { %148 = vmatpush.msra.mxu0 %v135_v4  ;;  %1769 = vmatpush.msra.mxu3 %v135_v4  ;;  %v119_v26 = vld [vmem:[#allocation4 + $0xd8] sm:$0xff]  ;;  %v120_v28 = vld [vmem:[#allocation4 + $0xe0] sm:$0xff]  ;;  %v121_v30 = vld [vmem:[#allocation4 + $0xe8] sm:$0xff] }
  0x1d   :  { %v99_v27 = vld [vmem:[#allocation4 + $0x38] sm:$0xff]  ;;  %v100_v29 = vld [vmem:[#allocation4 + $0x40] sm:$0xff]  ;;  %v101_v31 = vld [vmem:[#allocation4 + $0x48] sm:$0xff] }
  0x1e   :  { %149 = vmatpush.msra.mxu0 %v134_v5  ;;  %1770 = vmatpush.msra.mxu3 %v134_v5  ;;  %v122_v32 = vld [vmem:[#allocation4 + $0xf0] sm:$0xff]  ;;  %v123_v34 = vld [vmem:[#allocation4 + $0xf8] sm:$0xff]  ;;  %v104_v37 = vld [vmem:[#allocation4 + $0x60] sm:$0xff] }
  0x1f   :  { %v102_v33 = vld [vmem:[#allocation4 + $0x50] sm:$0xff]  ;;  %v103_v35 = vld [vmem:[#allocation4 + $0x58] sm:$0xff]  ;;  %v846_v39 = vld [vmem:[#allocation9 + $0x68] sm:$0xff] }
  0x20   :  { %150 = vmatpush.msra.mxu0 %v133_v6  ;;  %1771 = vmatpush.msra.mxu3 %v133_v6  ;;  %v848_v36 = vld [vmem:[#allocation9 + $0x78] sm:$0xff]  ;;  %v847_v38 = vld [vmem:[#allocation9 + $0x70] sm:$0xff]  ;;  %v845_v40 = vld [vmem:[#allocation9 + $0x60] sm:$0xff] }
  0x21   :  { %853 = vmatpush.msra.mxu1 %v848_v36  ;;  %v844_v41 = vld [vmem:[#allocation9 + $0x58] sm:$0xff]  ;;  %v105_v42 = vld [vmem:[#allocation4 + $0x68] sm:$0xff]  ;;  %v843_v43 = vld [vmem:[#allocation9 + $0x50] sm:$0xff] }
  0x22   :  { %151 = vmatpush.msra.mxu0 %v132_v7  ;;  %1772 = vmatpush.msra.mxu3 %v132_v7  ;;  %v842_v44 = vld [vmem:[#allocation9 + $0x48] sm:$0xff]  ;;  %v841_v45 = vld [vmem:[#allocation9 + $0x40] sm:$0xff]  ;;  %v840_v46 = vld [vmem:[#allocation9 + $0x38] sm:$0xff] }
  0x23   :  { %854 = vmatpush.msra.mxu1 %v847_v38  ;;  %v106_v47 = vld [vmem:[#allocation4 + $0x70] sm:$0xff]  ;;  %v838_v49 = vld [vmem:[#allocation9 + $0x28] sm:$0xff]  ;;  %v837_v50 = vld [vmem:[#allocation9 + $0x20] sm:$0xff] }
  0x24   :  { %152 = vmatpush.msra.mxu0 %v131_v8  ;;  %1773 = vmatpush.msra.mxu3 %v131_v8  ;;  %v839_v48 = vld [vmem:[#allocation9 + $0x30] sm:$0xff]  ;;  %v836_v51 = vld [vmem:[#allocation9 + $0x18] sm:$0xff]  ;;  %v834_v54 = vld [vmem:[#allocation9 + $0x8] sm:$0xff] }
  0x25   :  { %855 = vmatpush.msra.mxu1 %v846_v39  ;;  %v107_v52 = vld [vmem:[#allocation4 + $0x78] sm:$0xff]  ;;  %v835_v53 = vld [vmem:[#allocation9 + $0x10] sm:$0xff]  ;;  %v2288_v55 = vld [vmem:[%s3219_s3] ss:$0 sm:$0xff] }
  0x26   :  { %153 = vmatpush.msra.mxu0 %v130_v9  ;;  %1774 = vmatpush.msra.mxu3 %v130_v9  ;;  %v833_v56 = vld [vmem:[#allocation9] sm:$0xff]  ;;  %v109_v0 = vld [vmem:[#allocation4 + $0x88] sm:$0xff]  ;;  %v110_v7 = vld [vmem:[#allocation4 + $0x90] sm:$0xff] }
  0x27   :  { %856 = vmatpush.msra.mxu1 %v845_v40  ;;  %v108_v58 = vld [vmem:[#allocation4 + $0x80] sm:$0xff] }
  0x28   :  { %154 = vmatpush.msra.mxu0 %v129_v10  ;;  %1775 = vmatpush.msra.mxu3 %v129_v10 }
  0x29   :  { %857 = vmatpush.msra.mxu1 %v844_v41 }
  0x2a   :  { %155 = vmatpush.msra.mxu0 %v128_v11  ;;  %1776 = vmatpush.msra.mxu3 %v128_v11 }
  0x2b   :  { %858 = vmatpush.msra.mxu1 %v843_v43 }
  0x2c   :  { %156 = vmatpush.msra.mxu0 %v127_v12  ;;  %1777 = vmatpush.msra.mxu3 %v127_v12 }
  0x2d   :  { %859 = vmatpush.msra.mxu1 %v842_v44 }
  0x2e   :  { %157 = vmatpush.msra.mxu0 %v126_v13  ;;  %1778 = vmatpush.msra.mxu3 %v126_v13 }
  0x2f   :  { %860 = vmatpush.msra.mxu1 %v841_v45 }
  0x30   :  { %158 = vmatpush.msra.mxu0 %v125_v14  ;;  %1779 = vmatpush.msra.mxu3 %v125_v14 }
  0x31   :  { %861 = vmatpush.msra.mxu1 %v840_v46 }
  0x32   :  { %159 = vmatpush.msra.mxu0 %v124_v15  ;;  %1780 = vmatpush.msra.mxu3 %v124_v15 }
  0x33   :  { %160 = vmatmul.f32.vlgmr.msra.gmra.mxu0 %v92_v16  ;;  %232 = vmatmul.f32.vlgmr.msra.gmra.mxu3 %v116_v20 }
  0x34   :  { %1781 = vmatpush.msrb.mxu3 %v848_v36  ;;  %862 = vmatpush.msra.mxu1 %v839_v48 }
  0x36   :  { %1782 = vmatpush.msrb.mxu3 %v847_v38  ;;  %863 = vmatpush.msra.mxu1 %v838_v49 }
  0x38   :  { %1783 = vmatpush.msrb.mxu3 %v846_v39  ;;  %864 = vmatpush.msra.mxu1 %v837_v50 }
  0x3a   :  { %1784 = vmatpush.msrb.mxu3 %v845_v40  ;;  %865 = vmatpush.msra.mxu1 %v836_v51 }
  0x3b   :  { %163 = vmatmul.f32.gmra.mxu0 %v93_v17  ;;  %235 = vmatmul.f32.gmra.mxu3 %v117_v22 }
  0x3c   :  { %1785 = vmatpush.msrb.mxu3 %v844_v41  ;;  %866 = vmatpush.msra.mxu1 %v835_v53 }
  0x3e   :  { %1786 = vmatpush.msrb.mxu3 %v843_v43  ;;  %867 = vmatpush.msra.mxu1 %v834_v54 }
  0x40   :  { %1787 = vmatpush.msrb.mxu3 %v842_v44  ;;  %868 = vmatpush.msra.mxu1 %v833_v56 }
  0x42   :  { %1788 = vmatpush.msrb.mxu3 %v841_v45 }
  0x43   :  { %166 = vmatmul.f32.gmra.mxu0 %v94_v18  ;;  %238 = vmatmul.f32.gmra.mxu3 %v118_v24 }
  0x44   :  { %1789 = vmatpush.msrb.mxu3 %v840_v46 }
  0x46   :  { %1790 = vmatpush.msrb.mxu3 %v839_v48 }
  0x48   :  { %1791 = vmatpush.msrb.mxu3 %v838_v49 }
  0x4a   :  { %1792 = vmatpush.msrb.mxu3 %v837_v50 }
  0x4b   :  { %169 = vmatmul.f32.gmra.mxu0 %v95_v19  ;;  %241 = vmatmul.f32.gmra.mxu3 %v119_v26  ;;  %v111_v19 = vld [vmem:[#allocation4 + $0x98] sm:$0xff] }
  0x4c   :  { %1793 = vmatpush.msrb.mxu3 %v836_v51 }
  0x4e   :  { %1794 = vmatpush.msrb.mxu3 %v835_v53 }
  0x50   :  { %1795 = vmatpush.msrb.mxu3 %v834_v54 }
  0x52   :  { %1796 = vmatpush.msrb.mxu3 %v833_v56 }
  0x53   :  { %172 = vmatmul.f32.gmra.mxu0 %v96_v21  ;;  %244 = vmatmul.f32.gmra.mxu3 %v120_v28 }
  0x5b   :  { %175 = vmatmul.f32.gmra.mxu0 %v97_v23  ;;  %247 = vmatmul.f32.gmra.mxu3 %v121_v30 }
  0x63   :  { %178 = vmatmul.f32.gmra.mxu0 %v98_v25  ;;  %250 = vmatmul.f32.gmra.mxu3 %v122_v32 }
  0x6b   :  { %181 = vmatmul.f32.gmra.mxu0 %v99_v27  ;;  %253 = vmatmul.f32.gmra.mxu3 %v123_v34 }
  0x73   :  { %184 = vmatmul.f32.gmra.mxu0 %v100_v29 }
  0x7b   :  { %187 = vmatmul.f32.gmra.mxu0 %v101_v31 }
  0x83   :  { %190 = vmatmul.f32.gmra.mxu0 %v102_v33 }
  0x8b   :  { %193 = vmatmul.f32.gmra.mxu0 %v103_v35 }
  0x93   :  { %196 = vmatmul.f32.gmra.mxu0 %v104_v37  ;;  %v112_v37 = vld [vmem:[#allocation4 + $0xa0] sm:$0xff] }
  0x9b   :  { %199 = vmatmul.f32.gmra.mxu0 %v105_v42 }
  0xa3   :  { %202 = vmatmul.f32.gmra.mxu0 %v106_v47 }
  0xab   :  { %205 = vmatmul.f32.gmra.mxu0 %v107_v52 }
  0xb0   :  { %v161_v57 = vpop.f32.mrf.mxu0 }
  0xb1   :  { %v162_v59 = vadd.f32 %v2288_v55, %v161_v57 }
  0xb3   :  { %v353_v60 = vand.u32 2147483647, %v162_v59  ;;  %208 = vmatmul.f32.gmra.mxu0 %v108_v58  ;;  %v257_v25 = vmax.f32 %v162_v59, 0.0  ;;  %vm289_vm1 = vcmp.ne.f32.partialorder %v162_v59, %v162_v59 }
  0xb5   :  { %v385_v61 = vsub.f32 0.0, %v353_v60 }
  0xb6   :  { %v233_v48 = vpop.f32.mrf.mxu3 }
  0xb7   :  { %v417_v62 = vmul.f32 1.442695, %v385_v61  ;;  %v2311_v50 = vadd.f32 %v2288_v55, %v233_v48 }
  0xb8   :  { %v164_v63 = vpop.f32.mrf.mxu0 }
  0xb9   :  { %1823 = vpow2.f32 %v417_v62  ;;  %v2292_v1 = vadd.f32 %v2288_v55, %v164_v63  ;;  %v377_v56 = vand.u32 2147483647, %v2311_v50  ;;  %vm313_vm13 = vcmp.ne.f32.partialorder %v2311_v50, %v2311_v50 }
  0xbb   :  { %v354_v2 = vand.u32 2147483647, %v2292_v1  ;;  %211 = vmatmul.f32.gmra.mxu0 %v109_v0  ;;  %v258_v43 = vmax.f32 %v2292_v1, 0.0  ;;  %vm290_vm3 = vcmp.ne.f32.partialorder %v2292_v1, %v2292_v1 }
  0xbd   :  { %v386_v3 = vsub.f32 0.0, %v354_v2  ;;  %v409_v2 = vsub.f32 0.0, %v377_v56 }
  0xbf   :  { %v1824_v4 = vpop.eup %1823  ;;  %v419_v5 = vmul.f32 1.442695, %v386_v3 }
  0xc0   :  { %v167_v6 = vpop.f32.mrf.mxu0  ;;  %v481_v8 = vadd.f32 1.0, %v1824_v4  ;;  %v484_v9 = vmul.f32 -0.5, %v1824_v4  ;;  %v487_v14 = vand.u32 2147483647, %v1824_v4 }
  0xc1   :  { %1825 = vpow2.f32 %v419_v5  ;;  %v2296_v10 = vadd.f32 %v2288_v55, %v167_v6  ;;  %v465_v5 = vmul.f32 1.442695, %v409_v2 }
  0xc2   :  { %1827 = vlog2.f32 %v481_v8  ;;  %v485_v12 = vadd.f32 1.0, %v484_v9  ;;  %vm488_vm0 = vcmp.lt.f32.partialorder %v487_v14, 0.0004427343  ;;  %v236_v9 = vpop.f32.mrf.mxu3 }
  0xc3   :  { %v355_v11 = vand.u32 2147483647, %v2296_v10  ;;  %214 = vmatmul.f32.gmra.mxu0 %v110_v7  ;;  %vm291_vm5 = vcmp.ne.f32.partialorder %v2296_v10, %v2296_v10 }
  0xc4   :  { %v486_v20 = vmul.f32 %v1824_v4, %v485_v12 }
  0xc5   :  { %v387_v13 = vsub.f32 0.0, %v355_v11 }
  0xc7   :  { %v1826_v15 = vpop.eup %1825  ;;  %v421_v16 = vmul.f32 1.442695, %v387_v13  ;;  %v2324_v13 = vadd.f32 %v2288_v55, %v236_v9 }
  0xc8   :  { %v1828_v17 = vpop.eup %1827  ;;  %v170_v18 = vpop.f32.mrf.mxu0  ;;  %v490_v21 = vadd.f32 1.0, %v1826_v15  ;;  %v493_v24 = vmul.f32 -0.5, %v1826_v15  ;;  %v496_v32 = vand.u32 2147483647, %v1826_v15 }
  0xc9   :  { %1829 = vpow2.f32 %v421_v16  ;;  %v2300_v22 = vadd.f32 %v2288_v55, %v170_v18  ;;  %v483_v23 = vmul.f32 0.6931472, %v1828_v17  ;;  %v114_v18 = vld [vmem:[#allocation4 + $0xb0] sm:$0xff] }
  0xca   :  { %1831 = vlog2.f32 %v490_v21  ;;  %v494_v30 = vadd.f32 1.0, %v493_v24  ;;  %vm497_vm2 = vcmp.lt.f32.partialorder %v496_v32, 0.0004427343  ;;  %v378_v21 = vand.u32 2147483647, %v2324_v13 }
  0xcb   :  { %v356_v26 = vand.u32 2147483647, %v2300_v22  ;;  %217 = vmatmul.f32.gmra.mxu0 %v111_v19  ;;  %v489_v27 = vsel %vm488_vm0, %v486_v20, %v483_v23  ;;  %vm292_vm7 = vcmp.ne.f32.partialorder %v2300_v22, %v2300_v22 }
  0xcc   :  { %v769_v28 = vadd.f32 %v489_v27, %v257_v25  ;;  %v495_v42 = vmul.f32 %v1826_v15, %v494_v30  ;;  %v260_v25 = vmax.f32 %v2300_v22, 0.0 }
  0xcd   :  { %v388_v29 = vsub.f32 0.0, %v356_v26  ;;  %v410_v26 = vsub.f32 0.0, %v378_v21  ;;  %v281_v21 = vmax.f32 %v2311_v50, 0.0 }
  0xce   :  { %v801_v31 = vsel %vm289_vm1, %v162_v59, %v769_v28  ;;  %v113_v59 = vld [vmem:[#allocation4 + $0xa8] sm:$0xff]  ;;  %vm314_vm1 = vcmp.ne.f32.partialorder %v2324_v13, %v2324_v13 }
  0xcf   :  { %v1830_v33 = vpop.eup %1829  ;;  %v423_v34 = vmul.f32 1.442695, %v388_v29  ;;  %869 = vmatmul.f32.vlgmr.msra.gmra.mxu1 %v801_v31  ;;  %v467_v31 = vmul.f32 1.442695, %v410_v26 }
  0xd0   :  { %v1832_v35 = vpop.eup %1831  ;;  %v173_v36 = vpop.f32.mrf.mxu0  ;;  %v499_v38 = vadd.f32 1.0, %v1830_v33  ;;  %v502_v39 = vmul.f32 -0.5, %v1830_v33  ;;  %v505_v52 = vand.u32 2147483647, %v1830_v33 }
  0xd1   :  { %1833 = vpow2.f32 %v423_v34  ;;  %v2304_v40 = vadd.f32 %v2288_v55, %v173_v36  ;;  %v492_v41 = vmul.f32 0.6931472, %v1832_v35  ;;  %v239_v34 = vpop.f32.mrf.mxu3 }
  0xd2   :  { %1835 = vlog2.f32 %v499_v38  ;;  %v503_v47 = vadd.f32 1.0, %v502_v39  ;;  %vm506_vm4 = vcmp.lt.f32.partialorder %v505_v52, 0.0004427343 }
  0xd3   :  { %v357_v44 = vand.u32 2147483647, %v2304_v40  ;;  %220 = vmatmul.f32.gmra.mxu0 %v112_v37  ;;  %v498_v45 = vsel %vm497_vm2, %v495_v42, %v492_v41  ;;  %v2339_v41 = vadd.f32 %v2288_v55, %v239_v34  ;;  %vm293_vm9 = vcmp.ne.f32.partialorder %v2304_v40, %v2304_v40 }
  0xd4   :  { %v770_v46 = vadd.f32 %v498_v45, %v258_v43  ;;  %v504_v60 = vmul.f32 %v1830_v33, %v503_v47 }
  0xd5   :  { %v389_v49 = vsub.f32 0.0, %v357_v44  ;;  %v115_v44 = vld [vmem:[#allocation4 + $0xb8] sm:$0xff]  ;;  %v379_v56 = vand.u32 2147483647, %v2339_v41 }
  0xd6   :  { %v802_v51 = vsel %vm290_vm3, %v2292_v1, %v770_v46  ;;  %v259_v1 = vmax.f32 %v2296_v10, 0.0 }
  0xd7   :  { %v1834_v53 = vpop.eup %1833  ;;  %v425_v54 = vmul.f32 1.442695, %v389_v49  ;;  %872 = vmatmul.f32.gmra.mxu1 %v802_v51  ;;  %v261_v49 = vmax.f32 %v2304_v40, 0.0 }
  0xd8   :  { %v1836_v57 = vpop.eup %1835  ;;  %v176_v58 = vpop.f32.mrf.mxu0  ;;  %v508_v61 = vadd.f32 1.0, %v1834_v53  ;;  %v511_v62 = vmul.f32 -0.5, %v1834_v53  ;;  %v514_v12 = vand.u32 2147483647, %v1834_v53 }
  0xd9   :  { %1837 = vpow2.f32 %v425_v54  ;;  %v2316_v63 = vadd.f32 %v2288_v55, %v176_v58  ;;  %v501_v0 = vmul.f32 0.6931472, %v1836_v57 }
  0xda   :  { %1839 = vlog2.f32 %v508_v61  ;;  %v512_v7 = vadd.f32 1.0, %v511_v62  ;;  %vm515_vm6 = vcmp.lt.f32.partialorder %v514_v12, 0.0004427343 }
  0xdb   :  { %v358_v3 = vand.u32 2147483647, %v2316_v63  ;;  %223 = vmatmul.f32.gmra.mxu0 %v113_v59  ;;  %v507_v4 = vsel %vm506_vm4, %v504_v60, %v501_v0  ;;  %1841 = vpow2.f32 %v465_v5  ;;  %v262_v62 = vmax.f32 %v2316_v63, 0.0  ;;  %v242_v0 = vpop.f32.mrf.mxu3 }
  0xdc   :  { %v771_v6 = vadd.f32 %v507_v4, %v259_v1  ;;  %v513_v19 = vmul.f32 %v1834_v53, %v512_v7  ;;  %vm294_vm12 = vcmp.ne.f32.partialorder %v2316_v63, %v2316_v63 }
  0xdd   :  { %v390_v8 = vsub.f32 0.0, %v358_v3  ;;  %v2359_v3 = vadd.f32 %v2288_v55, %v242_v0 }
  0xde   :  { %v803_v11 = vsel %vm291_vm5, %v2296_v10, %v771_v6 }
  0xdf   :  { %v1838_v14 = vpop.eup %1837  ;;  %v427_v15 = vmul.f32 1.442695, %v390_v8  ;;  %875 = vmatmul.f32.gmra.mxu1 %v803_v11  ;;  %v411_v8 = vsub.f32 0.0, %v379_v56 }
  0xe0   :  { %v1840_v16 = vpop.eup %1839  ;;  %v179_v17 = vpop.f32.mrf.mxu0  ;;  %v517_v20 = vadd.f32 1.0, %v1838_v14  ;;  %v520_v10 = vmul.f32 -0.5, %v1838_v14  ;;  %v523_v37 = vand.u32 2147483647, %v1838_v14 }
  0xe1   :  { %1843 = vpow2.f32 %v427_v15  ;;  %v2328_v23 = vadd.f32 %v2288_v55, %v179_v17  ;;  %v510_v24 = vmul.f32 0.6931472, %v1840_v16  ;;  %v2331_v27 = vpop.eup %1841 }
  0xe2   :  { %1845 = vlog2.f32 %v517_v20  ;;  %v521_v33 = vadd.f32 1.0, %v520_v10  ;;  %v697_v35 = vadd.f32 1.0, %v2331_v27  ;;  %vm524_vm8 = vcmp.lt.f32.partialorder %v523_v37, 0.0004427343 }
  0xe3   :  { %v359_v28 = vand.u32 2147483647, %v2328_v23  ;;  %226 = vmatmul.f32.gmra.mxu0 %v114_v18  ;;  %v516_v29 = vsel %vm515_vm6, %v513_v19, %v510_v24  ;;  %1847 = vpow2.f32 %v467_v31  ;;  %v700_v59 = vmul.f32 -0.5, %v2331_v27 }
  0xe4   :  { %v772_v30 = vadd.f32 %v516_v29, %v260_v25  ;;  %1849 = vlog2.f32 %v697_v35  ;;  %v703_v4 = vand.u32 2147483647, %v2331_v27  ;;  %v380_v20 = vand.u32 2147483647, %v2359_v3 }
  0xe5   :  { %v391_v32 = vsub.f32 0.0, %v359_v28  ;;  %v701_v9 = vadd.f32 1.0, %v700_v59  ;;  %v469_v28 = vmul.f32 1.442695, %v411_v8  ;;  %vm295_vm15 = vcmp.ne.f32.partialorder %v2328_v23, %v2328_v23 }
  0xe6   :  { %v804_v36 = vsel %vm292_vm7, %v2300_v22, %v772_v30  ;;  %v522_v22 = vmul.f32 %v1838_v14, %v521_v33  ;;  %vm2369_vm11 = vcmp.lt.f32.partialorder %v703_v4, 0.0004427343  ;;  %v412_v35 = vsub.f32 0.0, %v380_v20 }
  0xe7   :  { %v1844_v38 = vpop.eup %1843  ;;  %v429_v39 = vmul.f32 1.442695, %v391_v32  ;;  %878 = vmatmul.f32.gmra.mxu1 %v804_v36  ;;  %v702_v19 = vmul.f32 %v2331_v27, %v701_v9  ;;  %v245_v32 = vpop.f32.mrf.mxu3  ;;  %vm315_vm6 = vcmp.ne.f32.partialorder %v2339_v41, %v2339_v41 }
  0xe8   :  { %v1846_v42 = vpop.eup %1845  ;;  %v182_v43 = vpop.f32.mrf.mxu0  ;;  %v526_v45 = vadd.f32 1.0, %v1844_v38  ;;  %v529_v46 = vmul.f32 -0.5, %v1844_v38  ;;  %v532_v51 = vand.u32 2147483647, %v1844_v38  ;;  %v2385_v37 = vadd.f32 %v2288_v55, %v245_v32 }
  0xe9   :  { %1851 = vpow2.f32 %v429_v39  ;;  %v2342_v47 = vadd.f32 %v2288_v55, %v182_v43  ;;  %v519_v48 = vmul.f32 0.6931472, %v1846_v42  ;;  %v2347_v57 = vpop.eup %1847 }
  0xea   :  { %1853 = vlog2.f32 %v526_v45  ;;  %v530_v54 = vadd.f32 1.0, %v529_v46  ;;  %v1850_v60 = vpop.eup %1849  ;;  %vm2354_vm10 = vcmp.lt.f32.partialorder %v532_v51, 0.0004427343  ;;  %v706_v16 = vadd.f32 1.0, %v2347_v57 }
  0xeb   :  { %v360_v52 = vand.u32 2147483647, %v2342_v47  ;;  %229 = vmatmul.f32.gmra.mxu0 %v115_v44  ;;  %v525_v53 = vsel %vm524_vm8, %v522_v22, %v519_v48  ;;  %v709_v33 = vmul.f32 -0.5, %v2347_v57  ;;  %v712_v22 = vand.u32 2147483647, %v2347_v57 }
  0xec   :  { %v773_v58 = vadd.f32 %v525_v53, %v261_v49  ;;  %v531_v7 = vmul.f32 %v1844_v38, %v530_v54  ;;  %v263_v53 = vmax.f32 %v2328_v23, 0.0  ;;  %v471_v54 = vmul.f32 1.442695, %v412_v35 }
  0xed   :  { %v392_v61 = vsub.f32 0.0, %v360_v52  ;;  %v710_v43 = vadd.f32 1.0, %v709_v33  ;;  %v381_v52 = vand.u32 2147483647, %v2385_v37  ;;  %v264_v4 = vmax.f32 %v2342_v47, 0.0 }
  0xee   :  { %v805_v2 = vsel %vm293_vm9, %v2304_v40, %v773_v58  ;;  %v699_v40 = vmul.f32 0.6931472, %v1850_v60  ;;  %vm2405_vm0 = vcmp.lt.f32.partialorder %v712_v22, 0.0004427343  ;;  %vm296_vm3 = vcmp.ne.f32.partialorder %v2342_v47, %v2342_v47 }
  0xef   :  { %v1852_v5 = vpop.eup %1851  ;;  %v431_v6 = vmul.f32 1.442695, %v392_v61  ;;  %881 = vmatmul.f32.gmra.mxu1 %v805_v2  ;;  %v413_v61 = vsub.f32 0.0, %v381_v52 }
  0xf0   :  { %v1854_v11 = vpop.eup %1853  ;;  %v185_v12 = vpop.f32.mrf.mxu0  ;;  %v535_v14 = vadd.f32 1.0, %v1852_v5  ;;  %v538_v15 = vmul.f32 -0.5, %v1852_v5  ;;  %v541_v29 = vand.u32 2147483647, %v1852_v5  ;;  %v705_v31 = vsel %vm2369_vm11, %v702_v19, %v699_v40 }
  0xf1   :  { %1855 = vpow2.f32 %v431_v6  ;;  %v2364_v17 = vadd.f32 %v2288_v55, %v185_v12  ;;  %v528_v18 = vmul.f32 0.6931472, %v1854_v11  ;;  %v793_v36 = vadd.f32 %v705_v31, %v281_v21 }
  0xf2   :  { %1857 = vlog2.f32 %v535_v14  ;;  %v539_v26 = vadd.f32 1.0, %v538_v15  ;;  %vm542_vm14 = vcmp.lt.f32.partialorder %v541_v29, 0.0004427343  ;;  %vm316_vm11 = vcmp.ne.f32.partialorder %v2359_v3, %v2359_v3 }
  0xf3   :  { %v361_v10 = vand.u32 2147483647, %v2364_v17  ;;  %v534_v25 = vsel %vm2354_vm10, %v531_v7, %v528_v18  ;;  %1859 = vlog2.f32 %v706_v16  ;;  %v248_v7 = vpop.f32.mrf.mxu3  ;;  %v265_v32 = vmax.f32 %v2364_v17, 0.0 }
  0xf4   :  { %v774_v27 = vadd.f32 %v534_v25, %v262_v62  ;;  %v540_v42 = vmul.f32 %v1852_v5, %v539_v26  ;;  %1861 = vpow2.f32 %v469_v28  ;;  %v282_v62 = vmax.f32 %v2324_v13, 0.0 }
  0xf5   :  { %v393_v30 = vsub.f32 0.0, %v361_v10  ;;  %v711_v5 = vmul.f32 %v2347_v57, %v710_v43  ;;  %v2415_v57 = vadd.f32 %v2288_v55, %v248_v7  ;;  %vm297_vm4 = vcmp.ne.f32.partialorder %v2364_v17, %v2364_v17 }
  0xf6   :  { %v806_v34 = vsel %vm294_vm12, %v2316_v63, %v774_v27  ;;  %v825_v63 = vsel %vm313_vm13, %v2311_v50, %v793_v36 }
  0xf7   :  { %v1856_v38 = vpop.eup %1855  ;;  %v433_v39 = vmul.f32 1.442695, %v393_v30  ;;  %884 = vmatmul.f32.gmra.mxu1 %v806_v34  ;;  %941 = vmatmul.f32.vlgmr.msrb.gmra.mxu3 %v825_v63  ;;  %v382_v29 = vand.u32 2147483647, %v2415_v57 }
  0xf8   :  { %v1858_v44 = vpop.eup %1857  ;;  %v188_v45 = vpop.f32.mrf.mxu0  ;;  %v544_v46 = vadd.f32 1.0, %v1856_v38  ;;  %v547_v48 = vmul.f32 -0.5, %v1856_v38  ;;  %v550_v9 = vand.u32 2147483647, %v1856_v38 }
  0xf9   :  { %1863 = vpow2.f32 %v433_v39  ;;  %v2393_v49 = vadd.f32 %v2288_v55, %v188_v45  ;;  %v537_v51 = vmul.f32 0.6931472, %v1858_v44  ;;  %v1860_v56 = vpop.eup %1859  ;;  %v414_v45 = vsub.f32 0.0, %v382_v29 }
  0xfa   :  { %1865 = vlog2.f32 %v544_v46  ;;  %v548_v59 = vadd.f32 1.0, %v547_v48  ;;  %v708_v0 = vmul.f32 0.6931472, %v1860_v56  ;;  %v2401_v2 = vpop.eup %1861  ;;  %vm551_vm2 = vcmp.lt.f32.partialorder %v550_v9, 0.0004427343 }
  0xfb   :  { %v362_v58 = vand.u32 2147483647, %v2393_v49  ;;  %v543_v50 = vsel %vm542_vm14, %v540_v42, %v537_v51  ;;  %1867 = vpow2.f32 %v471_v54  ;;  %v715_v10 = vadd.f32 1.0, %v2401_v2  ;;  %v251_v35 = vpop.f32.mrf.mxu3 }
  0xfc   :  { %v775_v60 = vadd.f32 %v543_v50, %v263_v53  ;;  %v549_v14 = vmul.f32 %v1856_v38, %v548_v59  ;;  %v714_v15 = vsel %vm2405_vm0, %v711_v5, %v708_v0  ;;  %v718_v26 = vmul.f32 -0.5, %v2401_v2 }
  0xfd   :  { %v394_v1 = vsub.f32 0.0, %v362_v58  ;;  %v794_v20 = vadd.f32 %v714_v15, %v282_v62  ;;  %v2438_v42 = vadd.f32 %v2288_v55, %v251_v35  ;;  %v283_v46 = vmax.f32 %v2339_v41, 0.0 }
  0xfe   :  { %v807_v8 = vsel %vm295_vm15, %v2328_v23, %v775_v60  ;;  %v473_v23 = vmul.f32 1.442695, %v413_v61  ;;  %v719_v39 = vadd.f32 1.0, %v718_v26  ;;  %v721_v48 = vand.u32 2147483647, %v2401_v2 }
  0xff   :  { %v1864_v11 = vpop.eup %1863  ;;  %v435_v12 = vmul.f32 1.442695, %v394_v1  ;;  %887 = vmatmul.f32.gmra.mxu1 %v807_v8  ;;  %v826_v25 = vsel %vm314_vm1, %v2324_v13, %v794_v20  ;;  %v266_v13 = vmax.f32 %v2393_v49, 0.0  ;;  %v383_v58 = vand.u32 2147483647, %v2438_v42 }
 0x100   :  { %v1866_v40 = vpop.eup %1865  ;;  %v191_v16 = vpop.f32.mrf.mxu0  ;;  %v553_v18 = vadd.f32 1.0, %v1864_v11  ;;  %v556_v19 = vmul.f32 -0.5, %v1864_v11  ;;  %944 = vmatmul.f32.gmra.mxu3 %v826_v25  ;;  %v559_v38 = vand.u32 2147483647, %v1864_v11  ;;  %v720_v60 = vmul.f32 %v2401_v2, %v719_v39 }
 0x101   :  { %1869 = vpow2.f32 %v435_v12  ;;  %v2418_v21 = vadd.f32 %v2288_v55, %v191_v16  ;;  %v546_v24 = vmul.f32 0.6931472, %v1866_v40  ;;  %v2430_v30 = vpop.eup %1867  ;;  %vm2453_vm7 = vcmp.lt.f32.partialorder %v721_v48, 0.0004427343 }
 0x102   :  { %1871 = vlog2.f32 %v553_v18  ;;  %v557_v33 = vadd.f32 1.0, %v556_v19  ;;  %vm560_vm5 = vcmp.lt.f32.partialorder %v559_v38, 0.0004427343  ;;  %v475_v5 = vmul.f32 1.442695, %v414_v45 }
 0x103   :  { %v363_v28 = vand.u32 2147483647, %v2418_v21  ;;  %v552_v27 = vsel %vm551_vm2, %v549_v14, %v546_v24  ;;  %1873 = vpow2.f32 %v473_v23  ;;  %v415_v7 = vsub.f32 0.0, %v383_v58 }
 0x104   :  { %v776_v31 = vadd.f32 %v552_v27, %v264_v4  ;;  %1875 = vlog2.f32 %v715_v10  ;;  %v558_v51 = vmul.f32 %v1864_v11, %v557_v33  ;;  %vm298_vm8 = vcmp.ne.f32.partialorder %v2393_v49, %v2393_v49  ;;  %v254_v11 = vpop.f32.mrf.mxu3 }
 0x105   :  { %v395_v34 = vsub.f32 0.0, %v363_v28  ;;  %v284_v2 = vmax.f32 %v2359_v3, 0.0  ;;  %v727_v9 = vmul.f32 -0.5, %v2430_v30  ;;  %v730_v20 = vand.u32 2147483647, %v2430_v30 }
 0x106   :  { %v808_v36 = vsel %vm296_vm3, %v2342_v47, %v776_v31  ;;  %v724_v47 = vadd.f32 1.0, %v2430_v30  ;;  %v477_v28 = vmul.f32 1.442695, %v415_v7  ;;  %v2469_v27 = vadd.f32 %v2288_v55, %v254_v11 }
 0x107   :  { %v1870_v43 = vpop.eup %1869  ;;  %v437_v44 = vmul.f32 1.442695, %v395_v34  ;;  %890 = vmatmul.f32.gmra.mxu1 %v808_v36  ;;  %v728_v23 = vadd.f32 1.0, %v727_v9  ;;  %vm2480_vm10 = vcmp.lt.f32.partialorder %v730_v20, 0.0004427343  ;;  %vm299_vm13 = vcmp.ne.f32.partialorder %v2418_v21, %v2418_v21 }
 0x108   :  { %v1872_v63 = vpop.eup %1871  ;;  %v194_v22 = vpop.f32.mrf.mxu0  ;;  %v562_v52 = vadd.f32 1.0, %v1870_v43  ;;  %v565_v53 = vmul.f32 -0.5, %v1870_v43  ;;  %v568_v15 = vand.u32 2147483647, %v1870_v43  ;;  %vm317_vm0 = vcmp.ne.f32.partialorder %v2385_v37, %v2385_v37 }
 0x109   :  { %1877 = vpow2.f32 %v437_v44  ;;  %v2444_v54 = vadd.f32 %v2288_v55, %v194_v22  ;;  %v555_v56 = vmul.f32 0.6931472, %v1872_v63  ;;  %v2447_v50 = vpop.eup %1873  ;;  %v729_v33 = vmul.f32 %v2430_v30, %v728_v23 }
 0x10a   :  { %1879 = vlog2.f32 %v562_v52  ;;  %v566_v59 = vadd.f32 1.0, %v565_v53  ;;  %v1876_v61 = vpop.eup %1875  ;;  %vm569_vm9 = vcmp.lt.f32.partialorder %v568_v15, 0.0004427343  ;;  %v384_v44 = vand.u32 2147483647, %v2469_v27 }
 0x10b   :  { %v364_v62 = vand.u32 2147483647, %v2444_v54  ;;  %v561_v0 = vsel %vm560_vm5, %v558_v51, %v555_v56  ;;  %v717_v6 = vmul.f32 0.6931472, %v1876_v61  ;;  %1881 = vlog2.f32 %v724_v47 }
 0x10c   :  { %v777_v4 = vadd.f32 %v561_v0, %v265_v32  ;;  %v567_v14 = vmul.f32 %v1870_v43, %v566_v59  ;;  %v736_v63 = vmul.f32 -0.5, %v2447_v50  ;;  %v285_v15 = vmax.f32 %v2385_v37, 0.0 }
 0x10d   :  { %v396_v8 = vsub.f32 0.0, %v364_v62  ;;  %v723_v40 = vsel %vm2453_vm7, %v720_v60, %v717_v6  ;;  %v416_v60 = vsub.f32 0.0, %v384_v44  ;;  %v739_v6 = vand.u32 2147483647, %v2447_v50 }
 0x10e   :  { %v809_v12 = vsel %vm297_vm4, %v2364_v17, %v777_v4  ;;  %v795_v19 = vadd.f32 %v723_v40, %v283_v46  ;;  %v267_v46 = vmax.f32 %v2418_v21, 0.0  ;;  %vm300_vm1 = vcmp.ne.f32.partialorder %v2444_v54, %v2444_v54 }
 0x10f   :  { %v1878_v16 = vpop.eup %1877  ;;  %v439_v18 = vmul.f32 1.442695, %v396_v8  ;;  %893 = vmatmul.f32.gmra.mxu1 %v809_v12  ;;  %vm2525_vm15 = vcmp.lt.f32.partialorder %v739_v6, 0.0004427343  ;;  %vm318_vm3 = vcmp.ne.f32.partialorder %v2415_v57, %v2415_v57  ;;  %vm319_vm7 = vcmp.ne.f32.partialorder %v2438_v42, %v2438_v42 }
 0x110   :  { %v1880_v24 = vpop.eup %1879  ;;  %v197_v10 = vpop.f32.mrf.mxu0  ;;  %v571_v25 = vadd.f32 1.0, %v1878_v16  ;;  %v574_v26 = vmul.f32 -0.5, %v1878_v16  ;;  %v827_v31 = vsel %vm315_vm6, %v2339_v41, %v795_v19  ;;  %v577_v32 = vand.u32 2147483647, %v1878_v16 }
 0x111   :  { %1883 = vpow2.f32 %v439_v18  ;;  %v2472_v17 = vadd.f32 %v2288_v55, %v197_v10  ;;  %v564_v29 = vmul.f32 0.6931472, %v1880_v24  ;;  %947 = vmatmul.f32.gmra.mxu3 %v827_v31  ;;  %v1882_v34 = vpop.eup %1881  ;;  %v288_v53 = vmax.f32 %v2469_v27, 0.0 }
 0x112   :  { %1885 = vlog2.f32 %v571_v25  ;;  %v575_v38 = vadd.f32 1.0, %v574_v26  ;;  %v726_v41 = vmul.f32 0.6931472, %v1882_v34  ;;  %vm2498_vm12 = vcmp.lt.f32.partialorder %v577_v32, 0.0004427343 }
 0x113   :  { %v365_v35 = vand.u32 2147483647, %v2472_v17  ;;  %v570_v36 = vsel %vm569_vm9, %v567_v14, %v564_v29  ;;  %1887 = vpow2.f32 %v475_v5  ;;  %v737_v5 = vadd.f32 1.0, %v736_v63 }
 0x114   :  { %v778_v43 = vadd.f32 %v570_v36, %v266_v13  ;;  %1889 = vpow2.f32 %v477_v28  ;;  %v732_v48 = vsel %vm2480_vm10, %v729_v33, %v726_v41  ;;  %v733_v13 = vadd.f32 1.0, %v2447_v50 }
 0x115   :  { %v397_v45 = vsub.f32 0.0, %v365_v35  ;;  %v576_v52 = vmul.f32 %v1878_v16, %v575_v38  ;;  %v796_v47 = vadd.f32 %v732_v48, %v284_v2  ;;  %v479_v14 = vmul.f32 1.442695, %v416_v60 }
 0x116   :  { %v810_v30 = vsel %vm298_vm8, %v2393_v49, %v778_v43  ;;  %1891 = vlog2.f32 %v733_v13  ;;  %v738_v40 = vmul.f32 %v2447_v50, %v737_v5  ;;  %v286_v13 = vmax.f32 %v2415_v57, 0.0 }
 0x117   :  { %v1884_v22 = vpop.eup %1883  ;;  %v441_v51 = vmul.f32 1.442695, %v397_v45  ;;  %896 = vmatmul.f32.gmra.mxu1 %v810_v30  ;;  %v828_v0 = vsel %vm316_vm11, %v2359_v3, %v796_v47  ;;  %v268_v3 = vmax.f32 %v2444_v54, 0.0  ;;  %v269_v6 = vmax.f32 %v2472_v17, 0.0 }
 0x118   :  { %v1886_v56 = vpop.eup %1885  ;;  %v200_v58 = vpop.f32.mrf.mxu0  ;;  %v580_v59 = vadd.f32 1.0, %v1884_v22  ;;  %v583_v49 = vmul.f32 -0.5, %v1884_v22  ;;  %v586_v4 = vand.u32 2147483647, %v1884_v22  ;;  %vm301_vm6 = vcmp.ne.f32.partialorder %v2472_v17, %v2472_v17 }
 0x119   :  { %1893 = vpow2.f32 %v441_v51  ;;  %v2503_v61 = vadd.f32 %v2288_v55, %v200_v58  ;;  %v573_v62 = vmul.f32 0.6931472, %v1886_v56  ;;  %v1888_v1 = vpop.eup %1887  ;;  %950 = vmatmul.f32.gmra.mxu3 %v828_v0 }
 0x11a   :  { %1895 = vlog2.f32 %v580_v59  ;;  %v2510_v7 = vpop.eup %1889  ;;  %v584_v11 = vadd.f32 1.0, %v583_v49  ;;  %vm2521_vm14 = vcmp.lt.f32.partialorder %v586_v4, 0.0004427343  ;;  %v742_v20 = vadd.f32 1.0, %v1888_v1 }
 0x11b   :  { %v366_v8 = vand.u32 2147483647, %v2503_v61  ;;  %v579_v2 = vsel %vm2498_vm12, %v576_v52, %v573_v62  ;;  %v745_v50 = vmul.f32 -0.5, %v1888_v1  ;;  %v748_v36 = vand.u32 2147483647, %v1888_v1 }
 0x11c   :  { %v779_v9 = vadd.f32 %v579_v2, %v267_v46  ;;  %v1892_v16 = vpop.eup %1891  ;;  %1897 = vlog2.f32 %v742_v20  ;;  %v751_v38 = vadd.f32 1.0, %v2510_v7  ;;  %v754_v44 = vmul.f32 -0.5, %v2510_v7 }
 0x11d   :  { %v398_v12 = vsub.f32 0.0, %v366_v8  ;;  %v735_v25 = vmul.f32 0.6931472, %v1892_v16  ;;  %v746_v41 = vadd.f32 1.0, %v745_v50  ;;  %vm2549_vm2 = vcmp.lt.f32.partialorder %v748_v36, 0.0004427343 }
 0x11e   :  { %v811_v18 = vsel %vm299_vm13, %v2418_v21, %v779_v9  ;;  %v585_v21 = vmul.f32 %v1884_v22, %v584_v11  ;;  %v755_v58 = vadd.f32 1.0, %v754_v44  ;;  %vm302_vm9 = vcmp.ne.f32.partialorder %v2503_v61, %v2503_v61  ;;  %v1549_v16 = vld [vmem:[#allocation10 + $0x38] sm:$0xff] }
 0x11f   :  { %v1894_v24 = vpop.eup %1893  ;;  %v443_v10 = vmul.f32 1.442695, %v398_v12  ;;  %899 = vmatmul.f32.gmra.mxu1 %v811_v18  ;;  %v741_v34 = vsel %vm2525_vm15, %v738_v40, %v735_v25  ;;  %v747_v63 = vmul.f32 %v1888_v1, %v746_v41  ;;  %v287_v40 = vmax.f32 %v2438_v42, 0.0 }
 0x120   :  { %v1896_v26 = vpop.eup %1895  ;;  %v203_v28 = vpop.f32.mrf.mxu0  ;;  %v589_v29 = vadd.f32 1.0, %v1894_v24  ;;  %v592_v31 = vmul.f32 -0.5, %v1894_v24  ;;  %v797_v35 = vadd.f32 %v741_v34, %v285_v15  ;;  %v595_v52 = vand.u32 2147483647, %v1894_v24 }
 0x121   :  { %1899 = vpow2.f32 %v443_v10  ;;  %v2532_v32 = vadd.f32 %v2288_v55, %v203_v28  ;;  %v582_v33 = vmul.f32 0.6931472, %v1896_v26  ;;  %v756_v11 = vmul.f32 %v2510_v7, %v755_v58  ;;  %v1556_v26 = vld [vmem:[#allocation10 + $0x70] sm:$0xff] }
 0x122   :  { %1901 = vlog2.f32 %v589_v29  ;;  %v593_v46 = vadd.f32 1.0, %v592_v31  ;;  %v829_v30 = vsel %vm317_vm0, %v2385_v37, %v797_v35  ;;  %v1898_v22 = vpop.eup %1897  ;;  %vm596_vm4 = vcmp.lt.f32.partialorder %v595_v52, 0.0004427343 }
 0x123   :  { %v367_v39 = vand.u32 2147483647, %v2532_v32  ;;  %v588_v43 = vsel %vm2521_vm14, %v585_v21, %v582_v33  ;;  %1903 = vpow2.f32 %v479_v14  ;;  %953 = vmatmul.f32.gmra.mxu3 %v829_v30  ;;  %v744_v37 = vmul.f32 0.6931472, %v1898_v22 }
 0x124   :  { %v780_v45 = vadd.f32 %v588_v43, %v268_v3  ;;  %1905 = vlog2.f32 %v751_v38  ;;  %v594_v60 = vmul.f32 %v1894_v24, %v593_v46  ;;  %v1557_v24 = vld [vmem:[#allocation10 + $0x78] sm:$0xff]  ;;  %v1555_v38 = vld [vmem:[#allocation10 + $0x68] sm:$0xff]  ;;  %vm320_vm12 = vcmp.ne.f32.partialorder %v2469_v27, %v2469_v27 }
 0x125   :  { %v399_v48 = vsub.f32 0.0, %v367_v39  ;;  %v750_v5 = vsel %vm2549_vm2, %v747_v63, %v744_v37  ;;  %1562 = vmatpush.msra.mxu2 %v1557_v24  ;;  %1797 = vmatpush.msra.mxu3 %v1557_v24  ;;  %v270_v39 = vmax.f32 %v2503_v61, 0.0  ;;  %vm303_vm13 = vcmp.ne.f32.partialorder %v2532_v32, %v2532_v32  ;;  %v1548_v24 = vld [vmem:[#allocation10 + $0x30] sm:$0xff] }
 0x126   :  { %v812_v51 = vsel %vm300_vm1, %v2444_v54, %v780_v45  ;;  %v757_v54 = vand.u32 2147483647, %v2510_v7  ;;  %v798_v8 = vadd.f32 %v750_v5, %v286_v13  ;;  %v1551_v5 = vld [vmem:[#allocation10 + $0x48] sm:$0xff] }
 0x127   :  { %v1900_v47 = vpop.eup %1899  ;;  %v445_v56 = vmul.f32 1.442695, %v399_v48  ;;  %902 = vmatmul.f32.gmra.mxu1 %v812_v51  ;;  %1563 = vmatpush.msra.mxu2 %v1556_v26 }
 0x128   :  { %v1902_v59 = vpop.eup %1901  ;;  %v206_v49 = vpop.f32.mrf.mxu0  ;;  %v598_v62 = vadd.f32 1.0, %v1900_v47  ;;  %v601_v0 = vmul.f32 -0.5, %v1900_v47  ;;  %v830_v15 = vsel %vm318_vm3, %v2415_v57, %v798_v8  ;;  %vm2571_vm5 = vcmp.lt.f32.partialorder %v757_v54, 0.0004427343  ;;  %1798 = vmatpush.msra.mxu3 %v1556_v26 }
 0x129   :  { %1907 = vpow2.f32 %v445_v56  ;;  %v2557_v1 = vadd.f32 %v2288_v55, %v206_v49  ;;  %v591_v4 = vmul.f32 0.6931472, %v1902_v59  ;;  %v2562_v2 = vpop.eup %1903  ;;  %v604_v20 = vand.u32 2147483647, %v1900_v47  ;;  %1564 = vmatpush.msra.mxu2 %v1555_v38 }
 0x12a   :  { %1909 = vlog2.f32 %v598_v62  ;;  %v1906_v12 = vpop.eup %1905  ;;  %v602_v19 = vadd.f32 1.0, %v601_v0  ;;  %v760_v50 = vadd.f32 1.0, %v2562_v2  ;;  %v763_v33 = vmul.f32 -0.5, %v2562_v2  ;;  %1799 = vmatpush.msra.mxu3 %v1555_v38  ;;  %v2608_v62 = vld [vmem:[%s3219_s3] ss:$0 sm:$0xff]  ;;  %v1545_v38 = vld [vmem:[#allocation10 + $0x18] sm:$0xff] }
 0x12b   :  { %v368_v9 = vand.u32 2147483647, %v2557_v1  ;;  %v597_v3 = vsel %vm596_vm4, %v594_v60, %v591_v4  ;;  %956 = vmatmul.f32.gmra.mxu3 %v830_v15  ;;  %v753_v7 = vmul.f32 0.6931472, %v1906_v12  ;;  %vm605_vm8 = vcmp.lt.f32.partialorder %v604_v20, 0.0004427343 }
 0x12c   :  { %v781_v14 = vadd.f32 %v597_v3, %v269_v6  ;;  %v603_v36 = vmul.f32 %v1900_v47, %v602_v19  ;;  %v764_v30 = vadd.f32 1.0, %v763_v33  ;;  %v766_v13 = vand.u32 2147483647, %v2562_v2  ;;  %v1552_v47 = vld [vmem:[#allocation10 + $0x50] sm:$0xff]  ;;  %v1550_v3 = vld [vmem:[#allocation10 + $0x40] sm:$0xff] }
 0x12d   :  { %v400_v18 = vsub.f32 0.0, %v368_v9  ;;  %v759_v25 = vsel %vm2571_vm5, %v756_v11, %v753_v7  ;;  %v271_v6 = vmax.f32 %v2532_v32, 0.0  ;;  %vm304_vm15 = vcmp.ne.f32.partialorder %v2557_v1, %v2557_v1 }
 0x12e   :  { %v813_v23 = vsel %vm301_vm6, %v2472_v17, %v781_v14  ;;  %v799_v31 = vadd.f32 %v759_v25, %v287_v40  ;;  %v765_v60 = vmul.f32 %v2562_v2, %v764_v30  ;;  %vm2613_vm10 = vcmp.lt.f32.partialorder %v766_v13, 0.0004427343 }
 0x12f   :  { %v2578_v10 = vpop.eup %1907  ;;  %v447_v57 = vmul.f32 1.442695, %v400_v18  ;;  %905 = vmatmul.f32.gmra.mxu1 %v813_v23 }
 0x130   :  { %v1910_v28 = vpop.eup %1909  ;;  %v209_v21 = vpop.f32.mrf.mxu0  ;;  %v607_v17 = vadd.f32 1.0, %v2578_v10  ;;  %v610_v29 = vmul.f32 -0.5, %v2578_v10  ;;  %v831_v43 = vsel %vm319_vm7, %v2438_v42, %v799_v31  ;;  %v1553_v42 = vld [vmem:[#allocation10 + $0x58] sm:$0xff]  ;;  %v613_v22 = vand.u32 2147483647, %v2578_v10  ;;  %v1546_v31 = vld [vmem:[#allocation10 + $0x20] sm:$0xff] }
 0x131   :  { %1911 = vpow2.f32 %v447_v57  ;;  %v2589_v34 = vadd.f32 %v2288_v55, %v209_v21  ;;  %v600_v35 = vmul.f32 0.6931472, %v1910_v28  ;;  %v1554_v55 = vld [vmem:[#allocation10 + $0x60] sm:$0xff]  ;;  %v1547_v21 = vld [vmem:[#allocation10 + $0x28] sm:$0xff] }
 0x132   :  { %1913 = vlog2.f32 %v607_v17  ;;  %v611_v46 = vadd.f32 1.0, %v610_v29  ;;  %1565 = vmatpush.msra.mxu2 %v1554_v55  ;;  %1800 = vmatpush.msra.mxu3 %v1554_v55  ;;  %vm614_vm11 = vcmp.lt.f32.partialorder %v613_v22, 0.0004427343  ;;  %v272_v17 = vmax.f32 %v2557_v1, 0.0  ;;  %v1544_v55 = vld [vmem:[#allocation10 + $0x10] sm:$0xff]  ;;  %v1543_v22 = vld [vmem:[#allocation10 + $0x8] sm:$0xff] }
 0x133   :  { %v369_v41 = vand.u32 2147483647, %v2589_v34  ;;  %v606_v44 = vsel %vm605_vm8, %v603_v36, %v600_v35  ;;  %1915 = vlog2.f32 %v760_v50  ;;  %959 = vmatmul.f32.gmra.mxu3 %v831_v43  ;;  %vm305_vm1 = vcmp.ne.f32.partialorder %v2589_v34, %v2589_v34 }
 0x134   :  { %v782_v45 = vadd.f32 %v606_v44, %v270_v39  ;;  %1566 = vmatpush.msra.mxu2 %v1553_v42  ;;  %v612_v58 = vmul.f32 %v2578_v10, %v611_v46  ;;  %1801 = vmatpush.msra.mxu3 %v1553_v42  ;;  %v2641_v42 = vld [vmem:[%s3221_s5] ss:$0 sm:$0xff] }
 0x135   :  { %v401_v48 = vsub.f32 0.0, %v369_v41 }
 0x136   :  { %v814_v63 = vsel %vm302_vm9, %v2503_v61, %v782_v45  ;;  %1567 = vmatpush.msra.mxu2 %v1552_v47  ;;  %1802 = vmatpush.msra.mxu3 %v1552_v47  ;;  %v1542_v47 = vld [vmem:[#allocation10] sm:$0xff] }
 0x137   :  { %v1912_v51 = vpop.eup %1911  ;;  %v449_v52 = vmul.f32 1.442695, %v401_v48  ;;  %908 = vmatmul.f32.gmra.mxu1 %v814_v63 }
 0x138   :  { %v1914_v56 = vpop.eup %1913  ;;  %v212_v37 = vpop.f32.mrf.mxu0  ;;  %v616_v59 = vadd.f32 1.0, %v1912_v51  ;;  %v619_v49 = vmul.f32 -0.5, %v1912_v51  ;;  %1568 = vmatpush.msra.mxu2 %v1551_v5  ;;  %1803 = vmatpush.msra.mxu3 %v1551_v5  ;;  %v622_v19 = vand.u32 2147483647, %v1912_v51 }
 0x139   :  { %v1916_v61 = vpop.eup %1915  ;;  %1917 = vpow2.f32 %v449_v52  ;;  %v2611_v0 = vadd.f32 %v2608_v62, %v212_v37  ;;  %v609_v54 = vmul.f32 0.6931472, %v1914_v56 }
 0x13a   :  { %1919 = vlog2.f32 %v616_v59  ;;  %v762_v8 = vmul.f32 0.6931472, %v1916_v61  ;;  %v620_v12 = vadd.f32 1.0, %v619_v49  ;;  %1569 = vmatpush.msra.mxu2 %v1550_v3  ;;  %1804 = vmatpush.msra.mxu3 %v1550_v3  ;;  %vm623_vm14 = vcmp.lt.f32.partialorder %v622_v19, 0.0004427343 }
 0x13b   :  { %v370_v2 = vand.u32 2147483647, %v2611_v0  ;;  %v615_v9 = vsel %vm614_vm11, %v612_v58, %v609_v54  ;;  %vm306_vm3 = vcmp.ne.f32.partialorder %v2611_v0, %v2611_v0 }
 0x13c   :  { %v783_v11 = vadd.f32 %v615_v9, %v271_v6  ;;  %v768_v14 = vsel %vm2613_vm10, %v765_v60, %v762_v8  ;;  %1570 = vmatpush.msra.mxu2 %v1549_v16  ;;  %v621_v25 = vmul.f32 %v1912_v51, %v620_v12  ;;  %1805 = vmatpush.msra.mxu3 %v1549_v16  ;;  %v273_v51 = vmax.f32 %v2589_v34, 0.0 }
 0x13d   :  { %v402_v15 = vsub.f32 0.0, %v370_v2  ;;  %v800_v40 = vadd.f32 %v768_v14, %v288_v53 }
 0x13e   :  { %v815_v18 = vsel %vm303_vm13, %v2532_v32, %v783_v11  ;;  %1571 = vmatpush.msra.mxu2 %v1548_v24  ;;  %1806 = vmatpush.msra.mxu3 %v1548_v24 }
 0x13f   :  { %v1918_v7 = vpop.eup %1917  ;;  %v451_v23 = vmul.f32 1.442695, %v402_v15  ;;  %911 = vmatmul.f32.gmra.mxu1 %v815_v18  ;;  %v832_v20 = vsel %vm320_vm12, %v2469_v27, %v800_v40 }
 0x140   :  { %v1920_v10 = vpop.eup %1919  ;;  %v215_v57 = vpop.f32.mrf.mxu0  ;;  %962 = vmatmul.f32.gmra.mxu3 %v832_v20  ;;  %v625_v50 = vadd.f32 1.0, %v1918_v7  ;;  %v628_v32 = vmul.f32 -0.5, %v1918_v7  ;;  %1572 = vmatpush.msra.mxu2 %v1547_v21  ;;  %v631_v43 = vand.u32 2147483647, %v1918_v7 }
 0x141   :  { %1921 = vpow2.f32 %v451_v23  ;;  %v2628_v26 = vadd.f32 %v2608_v62, %v215_v57  ;;  %v618_v28 = vmul.f32 0.6931472, %v1920_v10  ;;  %1807 = vmatpush.msra.mxu3 %v1547_v21 }
 0x142   :  { %1923 = vlog2.f32 %v625_v50  ;;  %v629_v36 = vadd.f32 1.0, %v628_v32  ;;  %1573 = vmatpush.msra.mxu2 %v1546_v31  ;;  %vm632_vm0 = vcmp.lt.f32.partialorder %v631_v43, 0.0004427343 }
 0x143   :  { %v371_v27 = vand.u32 2147483647, %v2628_v26  ;;  %v624_v29 = vsel %vm623_vm14, %v621_v25, %v618_v28  ;;  %1808 = vmatpush.msra.mxu3 %v1546_v31  ;;  %vm307_vm5 = vcmp.ne.f32.partialorder %v2628_v26, %v2628_v26 }
 0x144   :  { %v784_v33 = vadd.f32 %v624_v29, %v272_v17  ;;  %1574 = vmatpush.msra.mxu2 %v1545_v38  ;;  %v630_v63 = vmul.f32 %v1918_v7, %v629_v36 }
 0x145   :  { %v403_v35 = vsub.f32 0.0, %v371_v27  ;;  %1809 = vmatpush.msra.mxu3 %v1545_v38 }
 0x146   :  { %v816_v39 = vsel %vm304_vm15, %v2557_v1, %v784_v33  ;;  %1575 = vmatpush.msra.mxu2 %v1544_v55 }
 0x147   :  { %v1922_v41 = vpop.eup %1921  ;;  %v453_v44 = vmul.f32 1.442695, %v403_v35  ;;  %914 = vmatmul.f32.gmra.mxu1 %v816_v39  ;;  %1810 = vmatpush.msra.mxu3 %v1544_v55  ;;  %v275_v35 = vmax.f32 %v2628_v26, 0.0 }
 0x148   :  { %v1924_v45 = vpop.eup %1923  ;;  %v218_v46 = vpop.f32.mrf.mxu0  ;;  %v634_v30 = vadd.f32 1.0, %v1922_v41  ;;  %v637_v48 = vmul.f32 -0.5, %v1922_v41  ;;  %1576 = vmatpush.msra.mxu2 %v1543_v22  ;;  %v640_v61 = vand.u32 2147483647, %v1922_v41 }
 0x149   :  { %1925 = vpow2.f32 %v453_v44  ;;  %v2636_v13 = vadd.f32 %v2608_v62, %v218_v46  ;;  %v627_v1 = vmul.f32 0.6931472, %v1924_v45  ;;  %1811 = vmatpush.msra.mxu3 %v1543_v22 }
 0x14a   :  { %1927 = vlog2.f32 %v634_v30  ;;  %v638_v58 = vadd.f32 1.0, %v637_v48  ;;  %1577 = vmatpush.msra.mxu2 %v1542_v47  ;;  %vm641_vm2 = vcmp.lt.f32.partialorder %v640_v61, 0.0004427343 }
 0x14b   :  { %v372_v52 = vand.u32 2147483647, %v2636_v13  ;;  %v633_v53 = vsel %vm632_vm0, %v630_v63, %v627_v1  ;;  %1812 = vmatpush.msra.mxu3 %v1542_v47  ;;  %v276_v48 = vmax.f32 %v2636_v13, 0.0  ;;  %vm308_vm6 = vcmp.ne.f32.partialorder %v2636_v13, %v2636_v13 }
 0x14c   :  { %v870_v56 = vpop.f32.mrf.mxu1  ;;  %v785_v37 = vadd.f32 %v633_v53, %v273_v51  ;;  %v639_v2 = vmul.f32 %v1922_v41, %v638_v58 }
 0x14d   :  { %v404_v59 = vsub.f32 0.0, %v372_v52  ;;  %v2646_v49 = vadd.f32 %v2641_v42, %v870_v56 }
 0x14e   :  { %v817_v60 = vsel %vm305_vm1, %v2589_v34, %v785_v37  ;;  %v274_v34 = vmax.f32 %v2611_v0, 0.0 }
 0x14f   :  { %v1926_v54 = vpop.eup %1925  ;;  %v455_v4 = vmul.f32 1.442695, %v404_v59  ;;  %v1062_v5 = vand.u32 2147483647, %v2646_v49  ;;  %917 = vmatmul.f32.gmra.mxu1 %v817_v60  ;;  %v966_v53 = vmax.f32 %v2646_v49, 0.0  ;;  %vm998_vm7 = vcmp.ne.f32.partialorder %v2646_v49, %v2646_v49 }
 0x150   :  { %v1928_v6 = vpop.eup %1927  ;;  %v221_v8 = vpop.f32.mrf.mxu0  ;;  %v643_v9 = vadd.f32 1.0, %v1926_v54  ;;  %v646_v3 = vmul.f32 -0.5, %v1926_v54  ;;  %v649_v10 = vand.u32 2147483647, %v1926_v54 }
 0x151   :  { %1929 = vpow2.f32 %v455_v4  ;;  %v1094_v11 = vsub.f32 0.0, %v1062_v5  ;;  %v2653_v12 = vadd.f32 %v2608_v62, %v221_v8  ;;  %v636_v14 = vmul.f32 0.6931472, %v1928_v6 }
 0x152   :  { %1931 = vlog2.f32 %v643_v9  ;;  %v647_v7 = vadd.f32 1.0, %v646_v3  ;;  %vm650_vm4 = vcmp.lt.f32.partialorder %v649_v10, 0.0004427343 }
 0x153   :  { %v1126_v15 = vmul.f32 1.442695, %v1094_v11  ;;  %v373_v40 = vand.u32 2147483647, %v2653_v12  ;;  %v642_v16 = vsel %vm641_vm2, %v639_v2, %v636_v14  ;;  %v277_v59 = vmax.f32 %v2653_v12, 0.0 }
 0x154   :  { %v873_v18 = vpop.f32.mrf.mxu1  ;;  %v786_v19 = vadd.f32 %v642_v16, %v274_v34  ;;  %v648_v21 = vmul.f32 %v1926_v54, %v647_v7  ;;  %vm309_vm9 = vcmp.ne.f32.partialorder %v2653_v12, %v2653_v12 }
 0x155   :  { %1933 = vpow2.f32 %v1126_v15  ;;  %v405_v23 = vsub.f32 0.0, %v373_v40  ;;  %v2658_v20 = vadd.f32 %v2641_v42, %v873_v18 }
 0x156   :  { %v818_v24 = vsel %vm306_vm3, %v2611_v0, %v786_v19 }
 0x157   :  { %v1930_v57 = vpop.eup %1929  ;;  %v457_v25 = vmul.f32 1.442695, %v405_v23  ;;  %v1063_v50 = vand.u32 2147483647, %v2658_v20  ;;  %920 = vmatmul.f32.gmra.mxu1 %v818_v24  ;;  %v967_v6 = vmax.f32 %v2658_v20, 0.0  ;;  %vm999_vm11 = vcmp.ne.f32.partialorder %v2658_v20, %v2658_v20 }
 0x158   :  { %v1932_v28 = vpop.eup %1931  ;;  %v224_v32 = vpop.f32.mrf.mxu0  ;;  %v652_v17 = vadd.f32 1.0, %v1930_v57  ;;  %v655_v27 = vmul.f32 -0.5, %v1930_v57  ;;  %v658_v63 = vand.u32 2147483647, %v1930_v57 }
 0x159   :  { %1935 = vpow2.f32 %v457_v25  ;;  %v1095_v29 = vsub.f32 0.0, %v1063_v50  ;;  %v2665_v31 = vadd.f32 %v2608_v62, %v224_v32  ;;  %v645_v33 = vmul.f32 0.6931472, %v1932_v28 }
 0x15a   :  { %1937 = vlog2.f32 %v652_v17  ;;  %v656_v44 = vadd.f32 1.0, %v655_v27  ;;  %vm659_vm8 = vcmp.lt.f32.partialorder %v658_v63, 0.0004427343 }
 0x15b   :  { %v1934_v0 = vpop.eup %1933  ;;  %v1128_v36 = vmul.f32 1.442695, %v1095_v29  ;;  %v374_v38 = vand.u32 2147483647, %v2665_v31  ;;  %v651_v39 = vsel %vm650_vm4, %v648_v21, %v645_v33  ;;  %vm310_vm15 = vcmp.ne.f32.partialorder %v2665_v31, %v2665_v31 }
 0x15c   :  { %v876_v43 = vpop.f32.mrf.mxu1  ;;  %v787_v41 = vadd.f32 %v651_v39, %v275_v35  ;;  %v1190_v55 = vadd.f32 1.0, %v1934_v0  ;;  %v1193_v45 = vmul.f32 -0.5, %v1934_v0  ;;  %v657_v58 = vmul.f32 %v1930_v57, %v656_v44 }
 0x15d   :  { %1939 = vpow2.f32 %v1128_v36  ;;  %v406_v46 = vsub.f32 0.0, %v374_v38  ;;  %v2672_v30 = vadd.f32 %v2641_v42, %v876_v43  ;;  %v1196_v5 = vand.u32 2147483647, %v1934_v0 }
 0x15e   :  { %v819_v1 = vsel %vm307_vm5, %v2628_v26, %v787_v41  ;;  %1941 = vlog2.f32 %v1190_v55  ;;  %v1194_v47 = vadd.f32 1.0, %v1193_v45 }
 0x15f   :  { %v1936_v22 = vpop.eup %1935  ;;  %v459_v51 = vmul.f32 1.442695, %v406_v46  ;;  %v1064_v52 = vand.u32 2147483647, %v2672_v30  ;;  %923 = vmatmul.f32.gmra.mxu1 %v819_v1  ;;  %vm1197_vm10 = vcmp.lt.f32.partialorder %v1196_v5, 0.0004427343  ;;  %vm1000_vm1 = vcmp.ne.f32.partialorder %v2672_v30, %v2672_v30 }
 0x160   :  { %v1938_v56 = vpop.eup %1937  ;;  %v227_v37 = vpop.f32.mrf.mxu0  ;;  %v661_v60 = vadd.f32 1.0, %v1936_v22  ;;  %v664_v26 = vmul.f32 -0.5, %v1936_v22  ;;  %v1195_v11 = vmul.f32 %v1934_v0, %v1194_v47  ;;  %v667_v10 = vand.u32 2147483647, %v1936_v22 }
 0x161   :  { %1943 = vpow2.f32 %v459_v51  ;;  %v1096_v61 = vsub.f32 0.0, %v1064_v52  ;;  %v2682_v54 = vadd.f32 %v2608_v62, %v227_v37  ;;  %v654_v4 = vmul.f32 0.6931472, %v1938_v56 }
 0x162   :  { %1945 = vlog2.f32 %v661_v60  ;;  %v665_v40 = vadd.f32 1.0, %v664_v26  ;;  %vm668_vm12 = vcmp.lt.f32.partialorder %v667_v10, 0.0004427343  ;;  %v278_v26 = vmax.f32 %v2665_v31, 0.0 }
 0x163   :  { %v1940_v8 = vpop.eup %1939  ;;  %v1130_v2 = vmul.f32 1.442695, %v1096_v61  ;;  %v375_v9 = vand.u32 2147483647, %v2682_v54  ;;  %v660_v3 = vsel %vm659_vm8, %v657_v58, %v654_v4  ;;  %vm311_vm3 = vcmp.ne.f32.partialorder %v2682_v54, %v2682_v54 }
 0x164   :  { %v1942_v14 = vpop.eup %1941  ;;  %v879_v34 = vpop.f32.mrf.mxu1  ;;  %v788_v15 = vadd.f32 %v660_v3, %v276_v48  ;;  %v1199_v16 = vadd.f32 1.0, %v1940_v8  ;;  %v1202_v18 = vmul.f32 -0.5, %v1940_v8  ;;  %v666_v29 = vmul.f32 %v1936_v22, %v665_v40 }
 0x165   :  { %1947 = vpow2.f32 %v1130_v2  ;;  %v407_v19 = vsub.f32 0.0, %v375_v9  ;;  %v2689_v7 = vadd.f32 %v2641_v42, %v879_v34  ;;  %v1192_v23 = vmul.f32 0.6931472, %v1942_v14 }
 0x166   :  { %v820_v24 = vsel %vm308_vm6, %v2636_v13, %v788_v15  ;;  %1949 = vlog2.f32 %v1199_v16  ;;  %v1203_v32 = vadd.f32 1.0, %v1202_v18  ;;  %v1205_v33 = vand.u32 2147483647, %v1940_v8 }
 0x167   :  { %v1944_v57 = vpop.eup %1943  ;;  %v461_v25 = vmul.f32 1.442695, %v407_v19  ;;  %v1065_v50 = vand.u32 2147483647, %v2689_v7  ;;  %926 = vmatmul.f32.gmra.mxu1 %v820_v24  ;;  %v1198_v28 = vsel %vm1197_vm10, %v1195_v11, %v1192_v23  ;;  %v968_v40 = vmax.f32 %v2672_v30, 0.0 }
 0x168   :  { %v1946_v21 = vpop.eup %1945  ;;  %v230_v17 = vpop.f32.mrf.mxu0  ;;  %v1478_v27 = vadd.f32 %v1198_v28, %v966_v53  ;;  %v670_v35 = vadd.f32 1.0, %v1944_v57  ;;  %v673_v39 = vmul.f32 -0.5, %v1944_v57  ;;  %vm2708_vm13 = vcmp.lt.f32.partialorder %v1205_v33, 0.0004427343 }
 0x169   :  { %1951 = vpow2.f32 %v461_v25  ;;  %v1097_v0 = vsub.f32 0.0, %v1065_v50  ;;  %v2699_v13 = vadd.f32 %v2608_v62, %v230_v17  ;;  %v663_v36 = vmul.f32 0.6931472, %v1946_v21 }
 0x16a   :  { %v1510_v38 = vsel %vm998_vm7, %v2646_v49, %v1478_v27  ;;  %1953 = vlog2.f32 %v670_v35  ;;  %v1204_v62 = vmul.f32 %v1940_v8, %v1203_v32  ;;  %v674_v63 = vadd.f32 1.0, %v673_v39 }
 0x16b   :  { %v1948_v43 = vpop.eup %1947  ;;  %v1132_v41 = vmul.f32 1.442695, %v1097_v0  ;;  %v376_v44 = vand.u32 2147483647, %v2699_v13  ;;  %1578 = vmatmul.f32.vlgmr.msra.gmra.mxu2 %v1510_v38  ;;  %v669_v55 = vsel %vm668_vm12, %v666_v29, %v663_v36  ;;  %v676_v47 = vand.u32 2147483647, %v1944_v57 }
 0x16c   :  { %v1950_v45 = vpop.eup %1949  ;;  %v882_v46 = vpop.f32.mrf.mxu1  ;;  %v789_v48 = vadd.f32 %v669_v55, %v277_v59  ;;  %v1208_v22 = vadd.f32 1.0, %v1948_v43  ;;  %v1211_v56 = vmul.f32 -0.5, %v1948_v43  ;;  %v675_v5 = vmul.f32 %v1944_v57, %v674_v63 }
 0x16d   :  { %1955 = vpow2.f32 %v1132_v41  ;;  %v408_v49 = vsub.f32 0.0, %v376_v44  ;;  %v2713_v51 = vadd.f32 %v2641_v42, %v882_v46  ;;  %v1201_v52 = vmul.f32 0.6931472, %v1950_v45 }
 0x16e   :  { %v821_v53 = vsel %vm309_vm9, %v2653_v12, %v789_v48  ;;  %1957 = vlog2.f32 %v1208_v22  ;;  %v1212_v8 = vadd.f32 1.0, %v1211_v56  ;;  %vm677_vm14 = vcmp.lt.f32.partialorder %v676_v47, 0.0004427343 }
 0x16f   :  { %v1952_v37 = vpop.eup %1951  ;;  %v463_v58 = vmul.f32 1.442695, %v408_v49  ;;  %v1066_v59 = vand.u32 2147483647, %v2713_v51  ;;  %929 = vmatmul.f32.gmra.mxu1 %v821_v53  ;;  %v1207_v60 = vsel %vm2708_vm13, %v1204_v62, %v1201_v52  ;;  %v1214_v14 = vand.u32 2147483647, %v1948_v43 }
 0x170   :  { %v1954_v61 = vpop.eup %1953  ;;  %v1479_v4 = vadd.f32 %v1207_v60, %v967_v6  ;;  %v679_v12 = vadd.f32 1.0, %v1952_v37  ;;  %v682_v3 = vmul.f32 -0.5, %v1952_v37  ;;  %v1213_v23 = vmul.f32 %v1948_v43, %v1212_v8 }
 0x171   :  { %1959 = vpow2.f32 %v463_v58  ;;  %v1098_v2 = vsub.f32 0.0, %v1066_v59  ;;  %v672_v9 = vmul.f32 0.6931472, %v1954_v61  ;;  %vm1215_vm0 = vcmp.lt.f32.partialorder %v1214_v14, 0.0004427343 }
 0x172   :  { %v1511_v11 = vsel %vm999_vm11, %v2658_v20, %v1479_v4  ;;  %1961 = vlog2.f32 %v679_v12  ;;  %v683_v25 = vadd.f32 1.0, %v682_v3  ;;  %v685_v28 = vand.u32 2147483647, %v1952_v37 }
 0x173   :  { %v1956_v34 = vpop.eup %1955  ;;  %v1134_v15 = vmul.f32 1.442695, %v1098_v2  ;;  %1581 = vmatmul.f32.gmra.mxu2 %v1511_v11  ;;  %v678_v6 = vsel %vm677_vm14, %v675_v5, %v672_v9  ;;  %v279_v33 = vmax.f32 %v2682_v54, 0.0  ;;  %v969_v45 = vmax.f32 %v2689_v7, 0.0 }
 0x174   :  { %v1958_v16 = vpop.eup %1957  ;;  %v885_v18 = vpop.f32.mrf.mxu1  ;;  %v790_v19 = vadd.f32 %v678_v6, %v278_v26  ;;  %v1217_v24 = vadd.f32 1.0, %v1956_v34  ;;  %v1220_v10 = vmul.f32 -0.5, %v1956_v34  ;;  %vm686_vm2 = vcmp.lt.f32.partialorder %v685_v28, 0.0004427343 }
 0x175   :  { %1963 = vpow2.f32 %v1134_v15  ;;  %v2733_v20 = vadd.f32 %v2641_v42, %v885_v18  ;;  %v1210_v57 = vmul.f32 0.6931472, %v1958_v16  ;;  %v1223_v41 = vand.u32 2147483647, %v1956_v34 }
 0x176   :  { %v822_v50 = vsel %vm310_vm15, %v2665_v31, %v790_v19  ;;  %1965 = vlog2.f32 %v1217_v24  ;;  %v1221_v35 = vadd.f32 1.0, %v1220_v10  ;;  %v684_v31 = vmul.f32 %v1952_v37, %v683_v25 }
 0x177   :  { %v1960_v32 = vpop.eup %1959  ;;  %v1067_v21 = vand.u32 2147483647, %v2733_v20  ;;  %932 = vmatmul.f32.gmra.mxu1 %v822_v50  ;;  %v1216_v17 = vsel %vm1215_vm0, %v1213_v23, %v1210_v57  ;;  %vm1224_vm4 = vcmp.lt.f32.partialorder %v1223_v41, 0.0004427343  ;;  %vm1001_vm5 = vcmp.ne.f32.partialorder %v2689_v7, %v2689_v7 }
 0x178   :  { %v1962_v27 = vpop.eup %1961  ;;  %v1480_v29 = vadd.f32 %v1216_v17, %v968_v40  ;;  %v688_v0 = vadd.f32 1.0, %v1960_v32  ;;  %v691_v39 = vmul.f32 -0.5, %v1960_v32  ;;  %v1222_v63 = vmul.f32 %v1956_v34, %v1221_v35 }
 0x179   :  { %v1099_v36 = vsub.f32 0.0, %v1067_v21  ;;  %v681_v38 = vmul.f32 0.6931472, %v1962_v27  ;;  %v694_v37 = vand.u32 2147483647, %v1960_v32  ;;  %v280_v8 = vmax.f32 %v2699_v13, 0.0 }
 0x17a   :  { %v1512_v43 = vsel %vm1000_vm1, %v2672_v30, %v1480_v29  ;;  %1967 = vlog2.f32 %v688_v0  ;;  %v692_v53 = vadd.f32 1.0, %v691_v39  ;;  %v942_v47 = vpop.f32.mrf.mxu3  ;;  %vm312_vm7 = vcmp.ne.f32.partialorder %v2699_v13, %v2699_v13 }
 0x17b   :  { %v1964_v44 = vpop.eup %1963  ;;  %v1136_v55 = vmul.f32 1.442695, %v1099_v36  ;;  %1584 = vmatmul.f32.gmra.mxu2 %v1512_v43  ;;  %v687_v62 = vsel %vm686_vm2, %v684_v31, %v681_v38  ;;  %v2752_v4 = vadd.f32 %v2641_v42, %v942_v47  ;;  %vm695_vm6 = vcmp.lt.f32.partialorder %v694_v37, 0.0004427343 }
 0x17c   :  { %v1966_v46 = vpop.eup %1965  ;;  %v888_v48 = vpop.f32.mrf.mxu1  ;;  %v791_v1 = vadd.f32 %v687_v62, %v279_v33  ;;  %v1226_v22 = vadd.f32 1.0, %v1964_v44  ;;  %v1229_v49 = vmul.f32 -0.5, %v1964_v44  ;;  %v693_v12 = vmul.f32 %v1960_v32, %v692_v53 }
 0x17d   :  { %1969 = vpow2.f32 %v1136_v55  ;;  %v2745_v30 = vadd.f32 %v2641_v42, %v888_v48  ;;  %v1219_v52 = vmul.f32 0.6931472, %v1966_v46  ;;  %v1232_v9 = vand.u32 2147483647, %v1964_v44 }
 0x17e   :  { %v823_v56 = vsel %vm311_vm3, %v2682_v54, %v791_v1  ;;  %1971 = vlog2.f32 %v1226_v22  ;;  %v1230_v61 = vadd.f32 1.0, %v1229_v49  ;;  %v1086_v3 = vand.u32 2147483647, %v2752_v4 }
 0x17f   :  { %v1068_v58 = vand.u32 2147483647, %v2745_v30  ;;  %935 = vmatmul.f32.gmra.mxu1 %v823_v56  ;;  %v1225_v59 = vsel %vm1224_vm4, %v1222_v63, %v1219_v52  ;;  %v970_v57 = vmax.f32 %v2713_v51, 0.0  ;;  %vm1233_vm8 = vcmp.lt.f32.partialorder %v1232_v9, 0.0004427343 }
 0x180   :  { %v1968_v60 = vpop.eup %1967  ;;  %v1481_v26 = vadd.f32 %v1225_v59, %v969_v45  ;;  %v1231_v16 = vmul.f32 %v1964_v44, %v1230_v61  ;;  %v1118_v24 = vsub.f32 0.0, %v1086_v3  ;;  %vm1002_vm9 = vcmp.ne.f32.partialorder %v2713_v51, %v2713_v51 }
 0x181   :  { %v1100_v5 = vsub.f32 0.0, %v1068_v58  ;;  %v690_v54 = vmul.f32 0.6931472, %v1968_v60  ;;  %v971_v45 = vmax.f32 %v2733_v20, 0.0  ;;  %vm1003_vm11 = vcmp.ne.f32.partialorder %v2733_v20, %v2733_v20 }
 0x182   :  { %v1513_v2 = vsel %vm1001_vm5, %v2689_v7, %v1481_v26  ;;  %v1174_v32 = vmul.f32 1.442695, %v1118_v24  ;;  %vm1004_vm13 = vcmp.ne.f32.partialorder %v2745_v30, %v2745_v30  ;;  %vm1022_vm1 = vcmp.ne.f32.partialorder %v2752_v4, %v2752_v4 }
 0x183   :  { %v1970_v11 = vpop.eup %1969  ;;  %v1138_v14 = vmul.f32 1.442695, %v1100_v5  ;;  %1587 = vmatmul.f32.gmra.mxu2 %v1513_v2  ;;  %v696_v34 = vsel %vm695_vm6, %v693_v12, %v690_v54  ;;  %v945_v25 = vpop.f32.mrf.mxu3 }
 0x184   :  { %v1972_v15 = vpop.eup %1971  ;;  %v891_v6 = vpop.f32.mrf.mxu1  ;;  %v792_v40 = vadd.f32 %v696_v34, %v280_v8  ;;  %v1235_v18 = vadd.f32 1.0, %v1970_v11  ;;  %v1238_v19 = vmul.f32 -0.5, %v1970_v11  ;;  %v2766_v21 = vadd.f32 %v2641_v42, %v945_v25 }
 0x185   :  { %1973 = vpow2.f32 %v1138_v14  ;;  %v2760_v7 = vadd.f32 %v2641_v42, %v891_v6  ;;  %v1228_v23 = vmul.f32 0.6931472, %v1972_v15  ;;  %v1241_v35 = vand.u32 2147483647, %v1970_v11 }
 0x186   :  { %v824_v10 = vsel %vm312_vm7, %v2699_v13, %v792_v40  ;;  %1975 = vlog2.f32 %v1235_v18  ;;  %v1239_v27 = vadd.f32 1.0, %v1238_v19  ;;  %v1087_v13 = vand.u32 2147483647, %v2766_v21 }
 0x187   :  { %v1069_v50 = vand.u32 2147483647, %v2760_v7  ;;  %938 = vmatmul.f32.gmra.mxu1 %v824_v10  ;;  %v1234_v28 = vsel %vm1233_vm8, %v1231_v16, %v1228_v23  ;;  %1977 = vpow2.f32 %v1174_v32  ;;  %vm1242_vm10 = vcmp.lt.f32.partialorder %v1241_v35, 0.0004427343 }
 0x188   :  { %v1482_v17 = vadd.f32 %v1234_v28, %v970_v57  ;;  %v1119_v38 = vsub.f32 0.0, %v1087_v13  ;;  %v1240_v43 = vmul.f32 %v1970_v11, %v1239_v27  ;;  %v990_v16 = vmax.f32 %v2752_v4, 0.0 }
 0x189   :  { %v1101_v29 = vsub.f32 0.0, %v1069_v50  ;;  %v973_v57 = vmax.f32 %v2760_v7, 0.0  ;;  %vm1005_vm14 = vcmp.ne.f32.partialorder %v2760_v7, %v2760_v7  ;;  %vm1023_vm5 = vcmp.ne.f32.partialorder %v2766_v21, %v2766_v21 }
 0x18a   :  { %v1514_v33 = vsel %vm1002_vm9, %v2713_v51, %v1482_v17  ;;  %v1176_v1 = vmul.f32 1.442695, %v1119_v38 }
 0x18b   :  { %v1974_v0 = vpop.eup %1973  ;;  %v1140_v36 = vmul.f32 1.442695, %v1101_v29  ;;  %1590 = vmatmul.f32.gmra.mxu2 %v1514_v33 }
 0x18c   :  { %v1976_v31 = vpop.eup %1975  ;;  %v894_v39 = vpop.f32.mrf.mxu1  ;;  %v1244_v41 = vadd.f32 1.0, %v1974_v0  ;;  %v1247_v62 = vmul.f32 -0.5, %v1974_v0  ;;  %v1250_v53 = vand.u32 2147483647, %v1974_v0 }
 0x18d   :  { %1979 = vpow2.f32 %v1140_v36  ;;  %v2773_v44 = vadd.f32 %v2641_v42, %v894_v39  ;;  %v1237_v55 = vmul.f32 0.6931472, %v1976_v31  ;;  %v2776_v51 = vpop.eup %1977 }
 0x18e   :  { %1981 = vlog2.f32 %v1244_v41  ;;  %v1248_v49 = vadd.f32 1.0, %v1247_v62  ;;  %v1406_v47 = vadd.f32 1.0, %v2776_v51  ;;  %vm1251_vm12 = vcmp.lt.f32.partialorder %v1250_v53, 0.0004427343 }
 0x18f   :  { %v1070_v46 = vand.u32 2147483647, %v2773_v44  ;;  %v1243_v48 = vsel %vm1242_vm10, %v1240_v43, %v1237_v55  ;;  %1983 = vpow2.f32 %v1176_v1  ;;  %v1409_v34 = vmul.f32 -0.5, %v2776_v51 }
 0x190   :  { %v1483_v63 = vadd.f32 %v1243_v48, %v971_v45  ;;  %1985 = vlog2.f32 %v1406_v47  ;;  %v1249_v8 = vmul.f32 %v1974_v0, %v1248_v49  ;;  %v1412_v29 = vand.u32 2147483647, %v2776_v51 }
 0x191   :  { %v1102_v22 = vsub.f32 0.0, %v1070_v46  ;;  %v1410_v25 = vadd.f32 1.0, %v1409_v34  ;;  %v974_v47 = vmax.f32 %v2773_v44, 0.0  ;;  %vm1006_vm2 = vcmp.ne.f32.partialorder %v2773_v44, %v2773_v44 }
 0x192   :  { %v1515_v52 = vsel %vm1003_vm11, %v2733_v20, %v1483_v63  ;;  %v972_v20 = vmax.f32 %v2745_v30, 0.0  ;;  %vm1413_vm0 = vcmp.lt.f32.partialorder %v1412_v29, 0.0004427343  ;;  %v991_v34 = vmax.f32 %v2766_v21, 0.0 }
 0x193   :  { %v1980_v56 = vpop.eup %1979  ;;  %v1142_v37 = vmul.f32 1.442695, %v1102_v22  ;;  %1593 = vmatmul.f32.gmra.mxu2 %v1515_v52  ;;  %v1411_v43 = vmul.f32 %v2776_v51, %v1410_v25 }
 0x194   :  { %v1982_v58 = vpop.eup %1981  ;;  %v897_v59 = vpop.f32.mrf.mxu1  ;;  %v1253_v60 = vadd.f32 1.0, %v1980_v56  ;;  %v1256_v26 = vmul.f32 -0.5, %v1980_v56  ;;  %v1259_v19 = vand.u32 2147483647, %v1980_v56 }
 0x195   :  { %1987 = vpow2.f32 %v1142_v37  ;;  %v2784_v61 = vadd.f32 %v2641_v42, %v897_v59  ;;  %v1246_v5 = vmul.f32 0.6931472, %v1982_v58  ;;  %v948_v54 = vpop.f32.mrf.mxu3  ;;  %v2793_v15 = vpop.eup %1983 }
 0x196   :  { %1989 = vlog2.f32 %v1253_v60  ;;  %v2788_v12 = vadd.f32 %v2641_v42, %v948_v54  ;;  %v1257_v11 = vadd.f32 1.0, %v1256_v26  ;;  %v1986_v40 = vpop.eup %1985  ;;  %vm1260_vm15 = vcmp.lt.f32.partialorder %v1259_v19, 0.0004427343 }
 0x197   :  { %v1071_v2 = vand.u32 2147483647, %v2784_v61  ;;  %v1252_v9 = vsel %vm1251_vm12, %v1249_v8, %v1246_v5  ;;  %v1408_v27 = vmul.f32 0.6931472, %v1986_v40  ;;  %v1415_v38 = vadd.f32 1.0, %v2793_v15 }
 0x198   :  { %v1484_v3 = vadd.f32 %v1252_v9, %v972_v20  ;;  %v1088_v14 = vand.u32 2147483647, %v2788_v12  ;;  %v1258_v32 = vmul.f32 %v1980_v56, %v1257_v11  ;;  %v1418_v52 = vmul.f32 -0.5, %v2793_v15 }
 0x199   :  { %v1103_v6 = vsub.f32 0.0, %v1071_v2  ;;  %v1414_v48 = vsel %vm1413_vm0, %v1411_v43, %v1408_v27  ;;  %v1421_v58 = vand.u32 2147483647, %v2793_v15  ;;  %v975_v11 = vmax.f32 %v2784_v61, 0.0 }
 0x19a   :  { %v1516_v18 = vsel %vm1004_vm13, %v2745_v30, %v1484_v3  ;;  %v1120_v23 = vsub.f32 0.0, %v1088_v14  ;;  %v1502_v22 = vadd.f32 %v1414_v48, %v990_v16  ;;  %v1419_v2 = vadd.f32 1.0, %v1418_v52 }
 0x19b   :  { %v1988_v24 = vpop.eup %1987  ;;  %v1144_v10 = vmul.f32 1.442695, %v1103_v6  ;;  %1596 = vmatmul.f32.gmra.mxu2 %v1516_v18  ;;  %vm2834_vm4 = vcmp.lt.f32.partialorder %v1421_v58, 0.0004427343  ;;  %vm1007_vm7 = vcmp.ne.f32.partialorder %v2784_v61, %v2784_v61  ;;  %vm1024_vm11 = vcmp.ne.f32.partialorder %v2788_v12, %v2788_v12 }
 0x19c   :  { %v1990_v50 = vpop.eup %1989  ;;  %v900_v28 = vpop.f32.mrf.mxu1  ;;  %v1262_v17 = vadd.f32 1.0, %v1988_v24  ;;  %v1265_v33 = vmul.f32 -0.5, %v1988_v24  ;;  %v1178_v0 = vmul.f32 1.442695, %v1120_v23  ;;  %v1268_v55 = vand.u32 2147483647, %v1988_v24 }
 0x19d   :  { %1991 = vpow2.f32 %v1144_v10  ;;  %v2804_v30 = vadd.f32 %v2641_v42, %v900_v28  ;;  %v1255_v13 = vmul.f32 0.6931472, %v1990_v50  ;;  %v951_v35 = vpop.f32.mrf.mxu3  ;;  %v1534_v60 = vsel %vm1022_vm1, %v2752_v4, %v1502_v22 }
 0x19e   :  { %v2807_v36 = vadd.f32 %v2641_v42, %v951_v35  ;;  %1993 = vlog2.f32 %v1262_v17  ;;  %v1266_v46 = vadd.f32 1.0, %v1265_v33  ;;  %vm1269_vm3 = vcmp.lt.f32.partialorder %v1268_v55, 0.0004427343  ;;  %1650 = vmatmul.f32.vlgmr.msra.gmra.mxu3 %v1534_v60 }
 0x19f   :  { %v1072_v31 = vand.u32 2147483647, %v2804_v30  ;;  %v1261_v39 = vsel %vm1260_vm15, %v1258_v32, %v1255_v13  ;;  %1995 = vlog2.f32 %v1415_v38  ;;  %vm1008_vm8 = vcmp.ne.f32.partialorder %v2804_v30, %v2804_v30 }
 0x1a0   :  { %v1485_v41 = vadd.f32 %v1261_v39, %v973_v57  ;;  %v1089_v62 = vand.u32 2147483647, %v2807_v36  ;;  %1997 = vpow2.f32 %v1178_v0  ;;  %v1267_v5 = vmul.f32 %v1988_v24, %v1266_v46 }
 0x1a1   :  { %v1104_v45 = vsub.f32 0.0, %v1072_v31  ;;  %v1420_v24 = vmul.f32 %v2793_v15, %v1419_v2  ;;  %vm1025_vm15 = vcmp.ne.f32.partialorder %v2807_v36, %v2807_v36 }
 0x1a2   :  { %v1517_v1 = vsel %vm1005_vm14, %v2760_v7, %v1485_v41  ;;  %v1121_v63 = vsub.f32 0.0, %v1089_v62 }
 0x1a3   :  { %v1992_v51 = vpop.eup %1991  ;;  %v1146_v49 = vmul.f32 1.442695, %v1104_v45  ;;  %1599 = vmatmul.f32.gmra.mxu2 %v1517_v1 }
 0x1a4   :  { %v903_v53 = vpop.f32.mrf.mxu1  ;;  %v1271_v56 = vadd.f32 1.0, %v1992_v51  ;;  %v1274_v37 = vmul.f32 -0.5, %v1992_v51  ;;  %v1994_v59 = vpop.eup %1993  ;;  %v1180_v8 = vmul.f32 1.442695, %v1121_v63  ;;  %v1277_v23 = vand.u32 2147483647, %v1992_v51 }
 0x1a5   :  { %1999 = vpow2.f32 %v1146_v49  ;;  %v2823_v7 = vadd.f32 %v2641_v42, %v903_v53  ;;  %v1264_v26 = vmul.f32 0.6931472, %v1994_v59  ;;  %v1996_v9 = vpop.eup %1995  ;;  %v976_v63 = vmax.f32 %v2804_v30, 0.0 }
 0x1a6   :  { %2001 = vlog2.f32 %v1271_v56  ;;  %v1275_v20 = vadd.f32 1.0, %v1274_v37  ;;  %v954_v14 = vpop.f32.mrf.mxu3  ;;  %v2838_v4 = vpop.eup %1997  ;;  %v1417_v19 = vmul.f32 0.6931472, %v1996_v9  ;;  %vm1278_vm6 = vcmp.lt.f32.partialorder %v1277_v23, 0.0004427343 }
 0x1a7   :  { %v1073_v54 = vand.u32 2147483647, %v2823_v7  ;;  %v1270_v3 = vsel %vm1269_vm3, %v1267_v5, %v1264_v26  ;;  %v2841_v18 = vadd.f32 %v2641_v42, %v954_v14  ;;  %2003 = vpow2.f32 %v1180_v8 }
 0x1a8   :  { %v1486_v16 = vadd.f32 %v1270_v3, %v974_v47  ;;  %v1276_v50 = vmul.f32 %v1992_v51, %v1275_v20  ;;  %v1423_v29 = vsel %vm2834_vm4, %v1420_v24, %v1417_v19  ;;  %v1424_v13 = vadd.f32 1.0, %v2838_v4 }
 0x1a9   :  { %v1105_v40 = vsub.f32 0.0, %v1073_v54  ;;  %v1090_v28 = vand.u32 2147483647, %v2841_v18  ;;  %v1503_v0 = vadd.f32 %v1423_v29, %v991_v34  ;;  %v1427_v31 = vmul.f32 -0.5, %v2838_v4 }
 0x1aa   :  { %v1518_v25 = vsel %vm1006_vm2, %v2773_v44, %v1486_v16  ;;  %v1430_v49 = vand.u32 2147483647, %v2838_v4  ;;  %v992_v9 = vmax.f32 %v2788_v12, 0.0  ;;  %v977_v16 = vmax.f32 %v2823_v7, 0.0 }
 0x1ab   :  { %v2000_v10 = vpop.eup %1999  ;;  %v1148_v57 = vmul.f32 1.442695, %v1105_v40  ;;  %1602 = vmatmul.f32.gmra.mxu2 %v1518_v25  ;;  %v1122_v35 = vsub.f32 0.0, %v1090_v28  ;;  %v1535_v41 = vsel %vm1023_vm5, %v2766_v21, %v1503_v0  ;;  %v1428_v51 = vadd.f32 1.0, %v1427_v31 }
 0x1ac   :  { %v906_v32 = vpop.f32.mrf.mxu1  ;;  %v1280_v17 = vadd.f32 1.0, %v2000_v10  ;;  %v1283_v27 = vmul.f32 -0.5, %v2000_v10  ;;  %v2002_v15 = vpop.eup %2001  ;;  %v1286_v38 = vand.u32 2147483647, %v2000_v10  ;;  %1653 = vmatmul.f32.gmra.mxu3 %v1535_v41  ;;  %vm2889_vm10 = vcmp.lt.f32.partialorder %v1430_v49, 0.0004427343 }
 0x1ad   :  { %2005 = vpow2.f32 %v1148_v57  ;;  %v2855_v33 = vadd.f32 %v2641_v42, %v906_v32  ;;  %v1273_v44 = vmul.f32 0.6931472, %v2002_v15  ;;  %v2863_v55 = vpop.eup %2003  ;;  %v1182_v45 = vmul.f32 1.442695, %v1122_v35 }
 0x1ae   :  { %2007 = vlog2.f32 %v1280_v17  ;;  %v1284_v43 = vadd.f32 1.0, %v1283_v27  ;;  %v957_v46 = vpop.f32.mrf.mxu3  ;;  %vm2873_vm9 = vcmp.lt.f32.partialorder %v1286_v38, 0.0004427343  ;;  %v1433_v5 = vadd.f32 1.0, %v2863_v55  ;;  %v2924_v38 = vld [vmem:[%s3221_s5] ss:$0 sm:$0xff] }
 0x1af   :  { %v1074_v39 = vand.u32 2147483647, %v2855_v33  ;;  %v1279_v62 = vsel %vm1278_vm6, %v1276_v50, %v1273_v44  ;;  %2009 = vlog2.f32 %v1424_v13  ;;  %v2869_v22 = vadd.f32 %v2641_v42, %v957_v46 }
 0x1b0   :  { %v1487_v1 = vadd.f32 %v1279_v62, %v975_v11  ;;  %v1285_v56 = vmul.f32 %v2000_v10, %v1284_v43  ;;  %2011 = vpow2.f32 %v1182_v45  ;;  %v1429_v20 = vmul.f32 %v2838_v4, %v1428_v51 }
 0x1b1   :  { %v1106_v48 = vsub.f32 0.0, %v1074_v39  ;;  %v1091_v37 = vand.u32 2147483647, %v2869_v22  ;;  %v1436_v32 = vmul.f32 -0.5, %v2863_v55  ;;  %v1439_v44 = vand.u32 2147483647, %v2863_v55 }
 0x1b2   :  { %v1519_v47 = vsel %vm1007_vm7, %v2784_v61, %v1487_v1  ;;  %vm1009_vm13 = vcmp.ne.f32.partialorder %v2823_v7, %v2823_v7  ;;  %vm1010_vm0 = vcmp.ne.f32.partialorder %v2855_v33, %v2855_v33  ;;  %vm1026_vm3 = vcmp.ne.f32.partialorder %v2841_v18, %v2841_v18 }
 0x1b3   :  { %v2006_v52 = vpop.eup %2005  ;;  %v1150_v53 = vmul.f32 1.442695, %v1106_v48  ;;  %1605 = vmatmul.f32.gmra.mxu2 %v1519_v47  ;;  %v1123_v34 = vsub.f32 0.0, %v1091_v37  ;;  %v1437_v45 = vadd.f32 1.0, %v1436_v32  ;;  %vm1440_vm14 = vcmp.lt.f32.partialorder %v1439_v44, 0.0004427343 }
 0x1b4   :  { %v2008_v58 = vpop.eup %2007  ;;  %v909_v59 = vpop.f32.mrf.mxu1  ;;  %v1289_v60 = vadd.f32 1.0, %v2006_v52  ;;  %v1292_v26 = vmul.f32 -0.5, %v2006_v52  ;;  %v1295_v61 = vand.u32 2147483647, %v2006_v52 }
 0x1b5   :  { %2013 = vpow2.f32 %v1150_v53  ;;  %v2885_v8 = vadd.f32 %v2641_v42, %v909_v59  ;;  %v1282_v54 = vmul.f32 0.6931472, %v2008_v58  ;;  %v2010_v2 = vpop.eup %2009  ;;  %v1184_v29 = vmul.f32 1.442695, %v1123_v34 }
 0x1b6   :  { %2015 = vlog2.f32 %v1289_v60  ;;  %v1426_v6 = vmul.f32 0.6931472, %v2010_v2  ;;  %v960_v4 = vpop.f32.mrf.mxu3  ;;  %v1293_v23 = vadd.f32 1.0, %v1292_v26  ;;  %v2904_v57 = vpop.eup %2011  ;;  %vm2910_vm12 = vcmp.lt.f32.partialorder %v1295_v61, 0.0004427343 }
 0x1b7   :  { %v1075_v11 = vand.u32 2147483647, %v2885_v8  ;;  %v1288_v14 = vsel %vm2873_vm9, %v1285_v56, %v1282_v54  ;;  %2017 = vlog2.f32 %v1433_v5  ;;  %v2902_v10 = vadd.f32 %v2641_v42, %v960_v4 }
 0x1b8   :  { %v1488_v40 = vadd.f32 %v1288_v14, %v976_v63  ;;  %v1432_v24 = vsel %vm2889_vm10, %v1429_v20, %v1426_v6  ;;  %v1294_v43 = vmul.f32 %v2006_v52, %v1293_v23  ;;  %v1438_v51 = vmul.f32 %v2863_v55, %v1437_v45 }
 0x1b9   :  { %v1107_v19 = vsub.f32 0.0, %v1075_v11  ;;  %v1504_v28 = vadd.f32 %v1432_v24, %v992_v9  ;;  %v1092_v42 = vand.u32 2147483647, %v2902_v10  ;;  %v978_v52 = vmax.f32 %v2855_v33, 0.0 }
 0x1ba   :  { %v1520_v25 = vsel %vm1008_vm8, %v2804_v30, %v1488_v40  ;;  %v1442_v55 = vadd.f32 1.0, %v2904_v57  ;;  %v979_v23 = vmax.f32 %v2885_v8, 0.0  ;;  %vm1011_vm2 = vcmp.ne.f32.partialorder %v2885_v8, %v2885_v8 }
 0x1bb   :  { %v2014_v17 = vpop.eup %2013  ;;  %v1152_v27 = vmul.f32 1.442695, %v1107_v19  ;;  %1608 = vmatmul.f32.gmra.mxu2 %v1520_v25  ;;  %v1536_v30 = vsel %vm1024_vm11, %v2788_v12, %v1504_v28  ;;  %v1124_v62 = vsub.f32 0.0, %v1092_v42  ;;  %v993_v12 = vmax.f32 %v2807_v36, 0.0 }
 0x1bc   :  { %v2016_v13 = vpop.eup %2015  ;;  %v912_v15 = vpop.f32.mrf.mxu1  ;;  %v1298_v35 = vadd.f32 1.0, %v2014_v17  ;;  %v1301_v0 = vmul.f32 -0.5, %v2014_v17  ;;  %1656 = vmatmul.f32.gmra.mxu3 %v1536_v30  ;;  %v1304_v56 = vand.u32 2147483647, %v2014_v17  ;;  %vm1027_vm9 = vcmp.ne.f32.partialorder %v2869_v22, %v2869_v22 }
 0x1bd   :  { %2019 = vpow2.f32 %v1152_v27  ;;  %v2927_v31 = vadd.f32 %v2924_v38, %v912_v15  ;;  %v1291_v39 = vmul.f32 0.6931472, %v2016_v13  ;;  %v2018_v41 = vpop.eup %2017  ;;  %v1186_v47 = vmul.f32 1.442695, %v1124_v62 }
 0x1be   :  { %2021 = vlog2.f32 %v1298_v35  ;;  %v1302_v1 = vadd.f32 1.0, %v1301_v0  ;;  %v1435_v63 = vmul.f32 0.6931472, %v2018_v41  ;;  %vm1305_vm1 = vcmp.lt.f32.partialorder %v1304_v56, 0.0004427343 }
 0x1bf   :  { %v1076_v46 = vand.u32 2147483647, %v2927_v31  ;;  %v1297_v48 = vsel %vm2910_vm12, %v1294_v43, %v1291_v39  ;;  %2023 = vpow2.f32 %v1184_v29  ;;  %vm1012_vm6 = vcmp.ne.f32.partialorder %v2927_v31, %v2927_v31 }
 0x1c0   :  { %v1489_v21 = vadd.f32 %v1297_v48, %v977_v16  ;;  %v1441_v37 = vsel %vm1440_vm14, %v1438_v51, %v1435_v63  ;;  %v1303_v60 = vmul.f32 %v2014_v17, %v1302_v1  ;;  %v994_v17 = vmax.f32 %v2841_v18, 0.0 }
 0x1c1   :  { %v1108_v49 = vsub.f32 0.0, %v1076_v46  ;;  %v1505_v26 = vadd.f32 %v1441_v37, %v993_v12  ;;  %v995_v56 = vmax.f32 %v2869_v22, 0.0  ;;  %vm1028_vm10 = vcmp.ne.f32.partialorder %v2902_v10, %v2902_v10 }
 0x1c2   :  { %v1521_v53 = vsel %vm1009_vm13, %v2823_v7, %v1489_v21  ;;  %v1445_v7 = vmul.f32 -0.5, %v2904_v57 }
 0x1c3   :  { %v2020_v58 = vpop.eup %2019  ;;  %v1154_v59 = vmul.f32 1.442695, %v1108_v49  ;;  %v963_v5 = vpop.f32.mrf.mxu3  ;;  %1611 = vmatmul.f32.gmra.mxu2 %v1521_v53  ;;  %v1537_v14 = vsel %vm1025_vm15, %v2807_v36, %v1505_v26  ;;  %v1448_v36 = vand.u32 2147483647, %v2904_v57  ;;  %v980_v49 = vmax.f32 %v2927_v31, 0.0 }
 0x1c4   :  { %v2022_v54 = vpop.eup %2021  ;;  %v915_v20 = vpop.f32.mrf.mxu1  ;;  %v2942_v2 = vadd.f32 %v2924_v38, %v963_v5  ;;  %v1307_v61 = vadd.f32 1.0, %v2020_v58  ;;  %v1310_v9 = vmul.f32 -0.5, %v2020_v58  ;;  %1659 = vmatmul.f32.gmra.mxu3 %v1537_v14  ;;  %v1446_v24 = vadd.f32 1.0, %v1445_v7 }
 0x1c5   :  { %2025 = vpow2.f32 %v1154_v59  ;;  %v2946_v3 = vadd.f32 %v2924_v38, %v915_v20  ;;  %v1300_v11 = vmul.f32 0.6931472, %v2022_v54  ;;  %v2955_v6 = vpop.eup %2023  ;;  %v1313_v32 = vand.u32 2147483647, %v2020_v58 }
 0x1c6   :  { %v1093_v34 = vand.u32 2147483647, %v2942_v2  ;;  %2027 = vlog2.f32 %v1307_v61  ;;  %v1311_v4 = vadd.f32 1.0, %v1310_v9  ;;  %v1451_v13 = vadd.f32 1.0, %v2955_v6 }
 0x1c7   :  { %v1077_v40 = vand.u32 2147483647, %v2946_v3  ;;  %v1306_v16 = vsel %vm1305_vm1, %v1303_v60, %v1300_v11  ;;  %2029 = vlog2.f32 %v1442_v55  ;;  %v1454_v15 = vmul.f32 -0.5, %v2955_v6 }
 0x1c8   :  { %v1490_v19 = vadd.f32 %v1306_v16, %v978_v52  ;;  %2031 = vpow2.f32 %v1186_v47  ;;  %v1125_v50 = vsub.f32 0.0, %v1093_v34  ;;  %v1312_v42 = vmul.f32 %v2020_v58, %v1311_v4 }
 0x1c9   :  { %v1109_v25 = vsub.f32 0.0, %v1077_v40  ;;  %v1447_v0 = vmul.f32 %v2904_v57, %v1446_v24  ;;  %vm2972_vm4 = vcmp.lt.f32.partialorder %v1448_v36, 0.0004427343  ;;  %vm1314_vm5 = vcmp.lt.f32.partialorder %v1313_v32, 0.0004427343 }
 0x1ca   :  { %v1522_v28 = vsel %vm1010_vm0, %v2855_v33, %v1490_v19  ;;  %v1188_v62 = vmul.f32 1.442695, %v1125_v50  ;;  %v1455_v46 = vadd.f32 1.0, %v1454_v15  ;;  %v1457_v52 = vand.u32 2147483647, %v2955_v6 }
 0x1cb   :  { %v2026_v27 = vpop.eup %2025  ;;  %v1156_v29 = vmul.f32 1.442695, %v1109_v25  ;;  %1614 = vmatmul.f32.gmra.mxu2 %v1522_v28  ;;  %v981_v24 = vmax.f32 %v2946_v3, 0.0  ;;  %v996_v28 = vmax.f32 %v2902_v10, 0.0  ;;  %vm1013_vm13 = vcmp.ne.f32.partialorder %v2946_v3, %v2946_v3 }
 0x1cc   :  { %v2028_v30 = vpop.eup %2027  ;;  %v918_v35 = vpop.f32.mrf.mxu1  ;;  %v1316_v44 = vadd.f32 1.0, %v2026_v27  ;;  %v1319_v39 = vmul.f32 -0.5, %v2026_v27  ;;  %v1322_v58 = vand.u32 2147483647, %v2026_v27  ;;  %v1456_v20 = vmul.f32 %v2955_v6, %v1455_v46 }
 0x1cd   :  { %v2030_v43 = vpop.eup %2029  ;;  %2033 = vpow2.f32 %v1156_v29  ;;  %v2977_v41 = vadd.f32 %v2924_v38, %v918_v35  ;;  %v1309_v12 = vmul.f32 0.6931472, %v2028_v30  ;;  %vm2996_vm7 = vcmp.lt.f32.partialorder %v1457_v52, 0.0004427343 }
 0x1ce   :  { %v1444_v45 = vmul.f32 0.6931472, %v2030_v43  ;;  %2035 = vlog2.f32 %v1316_v44  ;;  %v2032_v48 = vpop.eup %2031  ;;  %v1320_v63 = vadd.f32 1.0, %v1319_v39  ;;  %vm1323_vm8 = vcmp.lt.f32.partialorder %v1322_v58, 0.0004427343 }
 0x1cf   :  { %v1078_v57 = vand.u32 2147483647, %v2977_v41  ;;  %v1315_v1 = vsel %vm1314_vm5, %v1312_v42, %v1309_v12  ;;  %2037 = vlog2.f32 %v1451_v13  ;;  %v1460_v59 = vadd.f32 1.0, %v2032_v48 }
 0x1d0   :  { %v1491_v21 = vadd.f32 %v1315_v1, %v979_v23  ;;  %v1450_v51 = vsel %vm2972_vm4, %v1447_v0, %v1444_v45  ;;  %2039 = vpow2.f32 %v1188_v62  ;;  %v1463_v60 = vmul.f32 -0.5, %v2032_v48 }
 0x1d1   :  { %v1110_v53 = vsub.f32 0.0, %v1078_v57  ;;  %v1506_v47 = vadd.f32 %v1450_v51, %v994_v17  ;;  %v1321_v54 = vmul.f32 %v2026_v27, %v1320_v63  ;;  %2041 = vlog2.f32 %v1460_v59 }
 0x1d2   :  { %v1523_v37 = vsel %vm1011_vm2, %v2885_v8, %v1491_v21  ;;  %v1464_v40 = vadd.f32 1.0, %v1463_v60  ;;  %v1466_v16 = vand.u32 2147483647, %v2032_v48  ;;  %v997_v60 = vmax.f32 %v2942_v2, 0.0 }
 0x1d3   :  { %v2034_v26 = vpop.eup %2033  ;;  %v1158_v5 = vmul.f32 1.442695, %v1110_v53  ;;  %v1538_v55 = vsel %vm1026_vm3, %v2841_v18, %v1506_v47  ;;  %1617 = vmatmul.f32.gmra.mxu2 %v1523_v37  ;;  %vm1029_vm15 = vcmp.ne.f32.partialorder %v2942_v2, %v2942_v2  ;;  %vm1014_vm1 = vcmp.ne.f32.partialorder %v2977_v41, %v2977_v41 }
 0x1d4   :  { %v2036_v61 = vpop.eup %2035  ;;  %v921_v9 = vpop.f32.mrf.mxu1  ;;  %1662 = vmatmul.f32.gmra.mxu3 %v1538_v55  ;;  %v1325_v8 = vadd.f32 1.0, %v2034_v26  ;;  %v1328_v11 = vmul.f32 -0.5, %v2034_v26  ;;  %v1465_v27 = vmul.f32 %v2032_v48, %v1464_v40  ;;  %v1331_v13 = vand.u32 2147483647, %v2034_v26 }
 0x1d5   :  { %v2038_v14 = vpop.eup %2037  ;;  %2043 = vpow2.f32 %v1158_v5  ;;  %v3001_v34 = vadd.f32 %v2924_v38, %v921_v9  ;;  %v1318_v18 = vmul.f32 0.6931472, %v2036_v61  ;;  %vm3016_vm11 = vcmp.lt.f32.partialorder %v1466_v16, 0.0004427343 }
 0x1d6   :  { %v1453_v6 = vmul.f32 0.6931472, %v2038_v14  ;;  %2045 = vlog2.f32 %v1325_v8  ;;  %v2040_v4 = vpop.eup %2039  ;;  %v1329_v50 = vadd.f32 1.0, %v1328_v11  ;;  %vm1332_vm12 = vcmp.lt.f32.partialorder %v1331_v13, 0.0004427343 }
 0x1d7   :  { %v1079_v19 = vand.u32 2147483647, %v3001_v34  ;;  %v1324_v23 = vsel %vm1323_vm8, %v1321_v54, %v1318_v18  ;;  %v2042_v29 = vpop.eup %2041  ;;  %v1469_v30 = vadd.f32 1.0, %v2040_v4  ;;  %v1472_v39 = vmul.f32 -0.5, %v2040_v4 }
 0x1d8   :  { %v1492_v36 = vadd.f32 %v1324_v23, %v980_v49  ;;  %v1459_v25 = vsel %vm2996_vm7, %v1456_v20, %v1453_v6  ;;  %v1462_v44 = vmul.f32 0.6931472, %v2042_v29  ;;  %v1475_v1 = vand.u32 2147483647, %v2040_v4 }
 0x1d9   :  { %v1111_v32 = vsub.f32 0.0, %v1079_v19  ;;  %v1507_v17 = vadd.f32 %v1459_v25, %v995_v56  ;;  %2047 = vlog2.f32 %v1469_v30  ;;  %v1473_v51 = vadd.f32 1.0, %v1472_v39 }
 0x1da   :  { %v1524_v42 = vsel %vm1012_vm6, %v2927_v31, %v1492_v36  ;;  %v1330_v31 = vmul.f32 %v2034_v26, %v1329_v50  ;;  %v1468_v57 = vsel %vm3016_vm11, %v1465_v27, %v1462_v44  ;;  %vm3038_vm14 = vcmp.lt.f32.partialorder %v1475_v1, 0.0004427343 }
 0x1db   :  { %v2044_v35 = vpop.eup %2043  ;;  %v1160_v0 = vmul.f32 1.442695, %v1111_v32  ;;  %v1539_v33 = vsel %vm1027_vm9, %v2869_v22, %v1507_v17  ;;  %1620 = vmatmul.f32.gmra.mxu2 %v1524_v42  ;;  %v1508_v22 = vadd.f32 %v1468_v57, %v996_v28  ;;  %v1474_v56 = vmul.f32 %v2040_v4, %v1473_v51  ;;  %v3061_v17 = vld [vmem:[%s3223_s7] ss:$0 sm:$0xff] }
 0x1dc   :  { %v2046_v43 = vpop.eup %2045  ;;  %v924_v62 = vpop.f32.mrf.mxu1  ;;  %1665 = vmatmul.f32.gmra.mxu3 %v1539_v33  ;;  %v1334_v12 = vadd.f32 1.0, %v2044_v35  ;;  %v1337_v45 = vmul.f32 -0.5, %v2044_v35  ;;  %v1340_v59 = vand.u32 2147483647, %v2044_v35  ;;  %v982_v54 = vmax.f32 %v2977_v41, 0.0 }
 0x1dd   :  { %2049 = vpow2.f32 %v1160_v0  ;;  %v3025_v46 = vadd.f32 %v2924_v38, %v924_v62  ;;  %v1327_v48 = vmul.f32 0.6931472, %v2046_v43  ;;  %v1540_v47 = vsel %vm1028_vm10, %v2902_v10, %v1508_v22 }
 0x1de   :  { %2051 = vlog2.f32 %v1334_v12  ;;  %v1338_v52 = vadd.f32 1.0, %v1337_v45  ;;  %vm1341_vm0 = vcmp.lt.f32.partialorder %v1340_v59, 0.0004427343  ;;  %v1676_v40 = vlaneseq }
 0x1df   :  { %v1080_v63 = vand.u32 2147483647, %v3025_v46  ;;  %v1333_v21 = vsel %vm1332_vm12, %v1330_v31, %v1327_v48  ;;  %v2048_v37 = vpop.eup %2047  ;;  %v1678_v27 = vstv %s3216_s0  ;;  %v983_v33 = vmax.f32 %v3001_v34, 0.0  ;;  %s2215_s0 = smov [#allocation12]  }
 0x1e0   :  { %v1493_v49 = vadd.f32 %v1333_v21, %v981_v24  ;;  %v1471_v20 = vmul.f32 0.6931472, %v2048_v37  ;;  %v1339_v10 = vmul.f32 %v2044_v35, %v1338_v52  ;;  %v1677_v25 = vand.u32 127, %v1676_v40  ;;  %s1748_s7 = sshll.u32 %s2215_s0, 4  ;;  %s1749_s7 = int_to_ptr.vmem [resolvable:$true] %s1748_s7 }
 0x1e1   :  { %v1112_v53 = vsub.f32 0.0, %v1080_v63  ;;  %vm1015_vm4 = vcmp.ne.f32.partialorder %v3001_v34, %v3001_v34  ;;  %v984_v37 = vmax.f32 %v3025_v46, 0.0  ;;  %vm1016_vm6 = vcmp.ne.f32.partialorder %v3025_v46, %v3025_v46 }
 0x1e2   :  { %v1525_v58 = vsel %vm1013_vm13, %v2946_v3, %v1493_v49  ;;  %v1477_v14 = vsel %vm3038_vm14, %v1474_v56, %v1471_v20  ;;  %vm3069_vm2 = vcmp.eq.s32.totalorder %v1677_v25, %v1678_v27 }
 0x1e3   :  { %v2050_v5 = vpop.eup %2049  ;;  %v1162_v55 = vmul.f32 1.442695, %v1112_v53  ;;  %1623 = vmatmul.f32.gmra.mxu2 %v1525_v58  ;;  %v1509_v18 = vadd.f32 %v1477_v14, %v997_v60 }
 0x1e4   :  { %v2052_v61 = vpop.eup %2051  ;;  %v927_v9 = vpop.f32.mrf.mxu1  ;;  %1668 = vmatmul.f32.gmra.mxu3 %v1540_v47  ;;  %v1343_v3 = vadd.f32 1.0, %v2050_v5  ;;  %v1346_v7 = vmul.f32 -0.5, %v2050_v5  ;;  %v1349_v50 = vand.u32 2147483647, %v2050_v5 }
 0x1e5   :  { %2053 = vpow2.f32 %v1162_v55  ;;  %v3046_v8 = vadd.f32 %v2924_v38, %v927_v9  ;;  %v1336_v11 = vmul.f32 0.6931472, %v2052_v61  ;;  %v1541_v23 = vsel %vm1029_vm15, %v2942_v2, %v1509_v18 }
 0x1e6   :  { %2055 = vlog2.f32 %v1343_v3  ;;  %v1347_v24 = vadd.f32 1.0, %v1346_v7  ;;  %vm1350_vm3 = vcmp.lt.f32.partialorder %v1349_v50, 0.0004427343 }
 0x1e7   :  { %v1081_v6 = vand.u32 2147483647, %v3046_v8  ;;  %v1342_v16 = vsel %vm1341_vm0, %v1339_v10, %v1336_v11  ;;  %vm1017_vm8 = vcmp.ne.f32.partialorder %v3046_v8, %v3046_v8 }
 0x1e8   :  { %v1494_v4 = vadd.f32 %v1342_v16, %v982_v54  ;;  %v1348_v30 = vmul.f32 %v2050_v5, %v1347_v24  ;;  %v985_v16 = vmax.f32 %v3046_v8, 0.0 }
 0x1e9   :  { %v1113_v19 = vsub.f32 0.0, %v1081_v6 }
 0x1ea   :  { %v1526_v36 = vsel %vm1014_vm1, %v2977_v41, %v1494_v4 }
 0x1eb   :  { %v2054_v28 = vpop.eup %2053  ;;  %v1164_v32 = vmul.f32 1.442695, %v1113_v19  ;;  %1626 = vmatmul.f32.gmra.mxu2 %v1526_v36 }
 0x1ec   :  { %v2056_v29 = vpop.eup %2055  ;;  %v930_v42 = vpop.f32.mrf.mxu1  ;;  %1671 = vmatmul.f32.gmra.mxu3 %v1541_v23  ;;  %v1352_v2 = vadd.f32 1.0, %v2054_v28  ;;  %v1355_v13 = vmul.f32 -0.5, %v2054_v28  ;;  %v1358_v57 = vand.u32 2147483647, %v2054_v28 }
 0x1ed   :  { %2057 = vpow2.f32 %v1164_v32  ;;  %v3067_v41 = vadd.f32 %v2924_v38, %v930_v42  ;;  %v1345_v15 = vmul.f32 0.6931472, %v2056_v29 }
 0x1ee   :  { %v1579_v35 = vpop.f32.mrf.mxu2  ;;  %2059 = vlog2.f32 %v1352_v2  ;;  %v1356_v31 = vadd.f32 1.0, %v1355_v13  ;;  %vm1359_vm5 = vcmp.lt.f32.partialorder %v1358_v57, 0.0004427343 }
 0x1ef   :  { %v1082_v44 = vand.u32 2147483647, %v3067_v41  ;;  %v1580_v39 = vadd.f32 %v3061_v17, %v1579_v35  ;;  %v1351_v43 = vsel %vm1350_vm3, %v1348_v30, %v1345_v15  ;;  %vm1018_vm10 = vcmp.ne.f32.partialorder %v3067_v41, %v3067_v41 }
 0x1f0   :  { %v1495_v62 = vadd.f32 %v1351_v43, %v983_v33  ;;  %v1357_v51 = vmul.f32 %v2054_v28, %v1356_v31 }
 0x1f1   :  { %v1114_v12 = vsub.f32 0.0, %v1082_v44  ;;  %v1680_v45 = vsel %vm3069_vm2, 0.0, %v1580_v39  ;;  %v986_v44 = vmax.f32 %v3067_v41, 0.0 }
 0x1f2   :  { %1712 = vst [vmem:[#allocation12] sm:$0xff] %v1680_v45  ;;  %v1527_v48 = vsel %vm1015_vm4, %v3001_v34, %v1495_v62 }
 0x1f3   :  { %v2058_v22 = vpop.eup %2057  ;;  %v1166_v1 = vmul.f32 1.442695, %v1114_v12  ;;  %1629 = vmatmul.f32.gmra.mxu2 %v1527_v48 }
 0x1f4   :  { %v2060_v63 = vpop.eup %2059  ;;  %v933_v21 = vpop.f32.mrf.mxu1  ;;  %v1361_v49 = vadd.f32 1.0, %v2058_v22  ;;  %v1364_v47 = vmul.f32 -0.5, %v2058_v22  ;;  %v1367_v20 = vand.u32 2147483647, %v2058_v22 }
 0x1f5   :  { %2061 = vpow2.f32 %v1166_v1  ;;  %v3082_v52 = vadd.f32 %v2924_v38, %v933_v21  ;;  %v1354_v53 = vmul.f32 0.6931472, %v2060_v63 }
 0x1f6   :  { %v1582_v56 = vpop.f32.mrf.mxu2  ;;  %2063 = vlog2.f32 %v1361_v49  ;;  %v1365_v55 = vadd.f32 1.0, %v1364_v47  ;;  %vm1368_vm7 = vcmp.lt.f32.partialorder %v1367_v20, 0.0004427343 }
 0x1f7   :  { %v1083_v34 = vand.u32 2147483647, %v3082_v52  ;;  %v1583_v58 = vadd.f32 %v3061_v17, %v1582_v56  ;;  %v1360_v59 = vsel %vm1359_vm5, %v1357_v51, %v1354_v53  ;;  %v987_v47 = vmax.f32 %v3082_v52, 0.0 }
 0x1f8   :  { %v1496_v60 = vadd.f32 %v1360_v59, %v984_v37  ;;  %v1366_v40 = vmul.f32 %v2058_v22, %v1365_v55  ;;  %vm1019_vm12 = vcmp.ne.f32.partialorder %v3082_v52, %v3082_v52 }
 0x1f9   :  { %v1115_v26 = vsub.f32 0.0, %v1083_v34  ;;  %v1681_v5 = vsel %vm3069_vm2, 0.0, %v1583_v58 }
 0x1fa   :  { %1713 = vst [vmem:[#allocation12 + $0x8] sm:$0xff] %v1681_v5  ;;  %v1528_v54 = vsel %vm1016_vm6, %v3025_v46, %v1496_v60 }
 0x1fb   :  { %v2062_v61 = vpop.eup %2061  ;;  %v1168_v9 = vmul.f32 1.442695, %v1115_v26  ;;  %1632 = vmatmul.f32.gmra.mxu2 %v1528_v54 }
 0x1fc   :  { %v2064_v10 = vpop.eup %2063  ;;  %v936_v3 = vpop.f32.mrf.mxu1  ;;  %v1370_v7 = vadd.f32 1.0, %v2062_v61  ;;  %v1373_v11 = vmul.f32 -0.5, %v2062_v61  ;;  %v1376_v28 = vand.u32 2147483647, %v2062_v61 }
 0x1fd   :  { %2065 = vpow2.f32 %v1168_v9  ;;  %v3093_v14 = vadd.f32 %v2924_v38, %v936_v3  ;;  %v1363_v18 = vmul.f32 0.6931472, %v2064_v10 }
 0x1fe   :  { %v1585_v6 = vpop.f32.mrf.mxu2  ;;  %2067 = vlog2.f32 %v1370_v7  ;;  %v1374_v24 = vadd.f32 1.0, %v1373_v11  ;;  %vm1377_vm9 = vcmp.lt.f32.partialorder %v1376_v28, 0.0004427343 }
 0x1ff   :  { %v1084_v46 = vand.u32 2147483647, %v3093_v14  ;;  %v1586_v4 = vadd.f32 %v3061_v17, %v1585_v6  ;;  %v1369_v19 = vsel %vm1368_vm7, %v1366_v40, %v1363_v18  ;;  %v988_v10 = vmax.f32 %v3093_v14, 0.0 }
 0x200   :  { %v1497_v23 = vadd.f32 %v1369_v19, %v985_v16  ;;  %v1375_v2 = vmul.f32 %v2062_v61, %v1374_v24  ;;  %vm1020_vm14 = vcmp.ne.f32.partialorder %v3093_v14, %v3093_v14 }
 0x201   :  { %v1116_v36 = vsub.f32 0.0, %v1084_v46  ;;  %v1682_v25 = vsel %vm3069_vm2, 0.0, %v1586_v4 }
 0x202   :  { %1714 = vst [vmem:[#allocation12 + $0x10] sm:$0xff] %v1682_v25  ;;  %v1529_v50 = vsel %vm1017_vm8, %v3046_v8, %v1497_v23 }
 0x203   :  { %v2066_v32 = vpop.eup %2065  ;;  %v1170_v27 = vmul.f32 1.442695, %v1116_v36  ;;  %1635 = vmatmul.f32.gmra.mxu2 %v1529_v50 }
 0x204   :  { %v2068_v29 = vpop.eup %2067  ;;  %v939_v42 = vpop.f32.mrf.mxu1  ;;  %v1379_v13 = vadd.f32 1.0, %v2066_v32  ;;  %v1382_v35 = vmul.f32 -0.5, %v2066_v32  ;;  %v1385_v48 = vand.u32 2147483647, %v2066_v32 }
 0x205   :  { %2069 = vpow2.f32 %v1170_v27  ;;  %v3104_v15 = vadd.f32 %v2924_v38, %v939_v42  ;;  %v1372_v30 = vmul.f32 0.6931472, %v2068_v29 }
 0x206   :  { %v1588_v33 = vpop.f32.mrf.mxu2  ;;  %2071 = vlog2.f32 %v1379_v13  ;;  %v1383_v38 = vadd.f32 1.0, %v1382_v35  ;;  %vm1386_vm11 = vcmp.lt.f32.partialorder %v1385_v48, 0.0004427343 }
 0x207   :  { %v1085_v8 = vand.u32 2147483647, %v3104_v15  ;;  %v1589_v39 = vadd.f32 %v3061_v17, %v1588_v33  ;;  %v1378_v43 = vsel %vm1377_vm9, %v1375_v2, %v1372_v30  ;;  %v989_v23 = vmax.f32 %v3104_v15, 0.0 }
 0x208   :  { %v1498_v62 = vadd.f32 %v1378_v43, %v986_v44  ;;  %v1384_v51 = vmul.f32 %v2066_v32, %v1383_v38  ;;  %vm1021_vm0 = vcmp.ne.f32.partialorder %v3104_v15, %v3104_v15 }
 0x209   :  { %v1117_v31 = vsub.f32 0.0, %v1085_v8  ;;  %v1683_v12 = vsel %vm3069_vm2, 0.0, %v1589_v39 }
 0x20a   :  { %1715 = vst [vmem:[#allocation12 + $0x18] sm:$0xff] %v1683_v12  ;;  %v1530_v45 = vsel %vm1018_vm10, %v3067_v41, %v1498_v62 }
 0x20b   :  { %v2070_v57 = vpop.eup %2069  ;;  %v1172_v22 = vmul.f32 1.442695, %v1117_v31  ;;  %1638 = vmatmul.f32.gmra.mxu2 %v1530_v45 }
 0x20c   :  { %v2072_v1 = vpop.eup %2071  ;;  %v1388_v63 = vadd.f32 1.0, %v2070_v57  ;;  %v1391_v49 = vmul.f32 -0.5, %v2070_v57  ;;  %v1394_v60 = vand.u32 2147483647, %v2070_v57 }
 0x20d   :  { %2073 = vpow2.f32 %v1172_v22  ;;  %v1381_v21 = vmul.f32 0.6931472, %v2072_v1 }
 0x20e   :  { %v1591_v53 = vpop.f32.mrf.mxu2  ;;  %2075 = vlog2.f32 %v1388_v63  ;;  %v1392_v58 = vadd.f32 1.0, %v1391_v49  ;;  %vm1395_vm13 = vcmp.lt.f32.partialorder %v1394_v60, 0.0004427343 }
 0x20f   :  { %v1592_v56 = vadd.f32 %v3061_v17, %v1591_v53  ;;  %v1387_v37 = vsel %vm1386_vm11, %v1384_v51, %v1381_v21 }
 0x210   :  { %v1499_v34 = vadd.f32 %v1387_v37, %v987_v47  ;;  %v1393_v20 = vmul.f32 %v2070_v57, %v1392_v58 }
 0x211   :  { %v1684_v41 = vsel %vm3069_vm2, 0.0, %v1592_v56 }
 0x212   :  { %1716 = vst [vmem:[#allocation12 + $0x20] sm:$0xff] %v1684_v41  ;;  %v1531_v59 = vsel %vm1019_vm12, %v3082_v52, %v1499_v34 }
 0x213   :  { %v2074_v26 = vpop.eup %2073  ;;  %1641 = vmatmul.f32.gmra.mxu2 %v1531_v59 }
 0x214   :  { %v2076_v5 = vpop.eup %2075  ;;  %v1397_v55 = vadd.f32 1.0, %v2074_v26  ;;  %v1400_v61 = vmul.f32 -0.5, %v2074_v26  ;;  %v1403_v6 = vand.u32 2147483647, %v2074_v26 }
 0x215   :  { %v1390_v54 = vmul.f32 0.6931472, %v2076_v5 }
 0x216   :  { %v1594_v9 = vpop.f32.mrf.mxu2  ;;  %2077 = vlog2.f32 %v1397_v55  ;;  %v1401_v18 = vadd.f32 1.0, %v1400_v61  ;;  %vm1404_vm15 = vcmp.lt.f32.partialorder %v1403_v6, 0.0004427343 }
 0x217   :  { %v1595_v3 = vadd.f32 %v3061_v17, %v1594_v9  ;;  %v1396_v7 = vsel %vm1395_vm13, %v1393_v20, %v1390_v54 }
 0x218   :  { %v1500_v11 = vadd.f32 %v1396_v7, %v988_v10  ;;  %v1402_v4 = vmul.f32 %v2074_v26, %v1401_v18 }
 0x219   :  { %v1685_v52 = vsel %vm3069_vm2, 0.0, %v1595_v3 }
 0x21a   :  { %1717 = vst [vmem:[#allocation12 + $0x28] sm:$0xff] %v1685_v52  ;;  %v1532_v40 = vsel %vm1020_vm14, %v3093_v14, %v1500_v11 }
 0x21b   :  { %1644 = vmatmul.f32.gmra.mxu2 %v1532_v40 }
 0x21c   :  { %v2078_v16 = vpop.eup %2077 }
 0x21d   :  { %v1399_v46 = vmul.f32 0.6931472, %v2078_v16 }
 0x21e   :  { %v1597_v19 = vpop.f32.mrf.mxu2 }
 0x21f   :  { %v1598_v24 = vadd.f32 %v3061_v17, %v1597_v19  ;;  %v1405_v36 = vsel %vm1404_vm15, %v1402_v4, %v1399_v46 }
 0x220   :  { %v1501_v25 = vadd.f32 %v1405_v36, %v989_v23 }
 0x221   :  { %v1686_v50 = vsel %vm3069_vm2, 0.0, %v1598_v24  ;;  %v1651_v29 = vpop.f32.mrf.mxu3 }
 0x222   :  { %1718 = vst [vmem:[#allocation12 + $0x30] sm:$0xff] %v1686_v50  ;;  %v1533_v14 = vsel %vm1021_vm0, %v3104_v15, %v1501_v25  ;;  %v1652_v42 = vadd.f32 %v3061_v17, %v1651_v29 }
 0x223   :  { %1647 = vmatmul.f32.gmra.mxu2 %v1533_v14 }
 0x224   :  { %v1704_v2 = vsel %vm3069_vm2, 0.0, %v1652_v42 }
 0x225   :  { %1736 = vst [vmem:[#allocation12 + $0xc0] sm:$0xff] %v1704_v2 }
 0x226   :  { %v1600_v28 = vpop.f32.mrf.mxu2 }
 0x227   :  { %v1601_v32 = vadd.f32 %v3061_v17, %v1600_v28 }
 0x229   :  { %v1687_v27 = vsel %vm3069_vm2, 0.0, %v1601_v32 }
 0x22a   :  { %1719 = vst [vmem:[#allocation12 + $0x38] sm:$0xff] %v1687_v27 }
 0x22e   :  { %v1603_v13 = vpop.f32.mrf.mxu2 }
 0x22f   :  { %v1604_v30 = vadd.f32 %v3061_v17, %v1603_v13  ;;  %v1654_v35 = vpop.f32.mrf.mxu3 }
 0x230   :  { %v1655_v33 = vadd.f32 %v3061_v17, %v1654_v35 }
 0x231   :  { %v1688_v15 = vsel %vm3069_vm2, 0.0, %v1604_v30 }
 0x232   :  { %1720 = vst [vmem:[#allocation12 + $0x40] sm:$0xff] %v1688_v15  ;;  %v1705_v44 = vsel %vm3069_vm2, 0.0, %v1655_v33 }
 0x233   :  { %1737 = vst [vmem:[#allocation12 + $0xc8] sm:$0xff] %v1705_v44 }
 0x236   :  { %v1606_v8 = vpop.f32.mrf.mxu2 }
 0x237   :  { %v1607_v39 = vadd.f32 %v3061_v17, %v1606_v8 }
 0x239   :  { %v1689_v43 = vsel %vm3069_vm2, 0.0, %v1607_v39 }
 0x23a   :  { %1721 = vst [vmem:[#allocation12 + $0x48] sm:$0xff] %v1689_v43 }
 0x23e   :  { %v1609_v62 = vpop.f32.mrf.mxu2 }
 0x23f   :  { %v1610_v31 = vadd.f32 %v3061_v17, %v1609_v62  ;;  %v1657_v12 = vpop.f32.mrf.mxu3 }
 0x240   :  { %v1658_v38 = vadd.f32 %v3061_v17, %v1657_v12 }
 0x241   :  { %v1690_v45 = vsel %vm3069_vm2, 0.0, %v1610_v31 }
 0x242   :  { %1722 = vst [vmem:[#allocation12 + $0x50] sm:$0xff] %v1690_v45  ;;  %v1706_v48 = vsel %vm3069_vm2, 0.0, %v1658_v38 }
 0x243   :  { %1738 = vst [vmem:[#allocation12 + $0xd0] sm:$0xff] %v1706_v48 }
 0x246   :  { %v1612_v57 = vpop.f32.mrf.mxu2 }
 0x247   :  { %v1613_v22 = vadd.f32 %v3061_v17, %v1612_v57  ;;  %v1660_v1 = vpop.f32.mrf.mxu3 }
 0x248   :  { %v1661_v21 = vadd.f32 %v3061_v17, %v1660_v1 }
 0x249   :  { %v1691_v63 = vsel %vm3069_vm2, 0.0, %v1613_v22 }
 0x24a   :  { %1723 = vst [vmem:[#allocation12 + $0x58] sm:$0xff] %v1691_v63  ;;  %v1707_v51 = vsel %vm3069_vm2, 0.0, %v1661_v21 }
 0x24b   :  { %1739 = vst [vmem:[#allocation12 + $0xd8] sm:$0xff] %v1707_v51 }
 0x24e   :  { %v1615_v49 = vpop.f32.mrf.mxu2 }
 0x24f   :  { %v1616_v53 = vadd.f32 %v3061_v17, %v1615_v49 }
 0x251   :  { %v1692_v47 = vsel %vm3069_vm2, 0.0, %v1616_v53 }
 0x252   :  { %1724 = vst [vmem:[#allocation12 + $0x60] sm:$0xff] %v1692_v47 }
 0x256   :  { %v1618_v56 = vpop.f32.mrf.mxu2 }
 0x257   :  { %v1663_v37 = vpop.f32.mrf.mxu3  ;;  %v1619_v34 = vadd.f32 %v3061_v17, %v1618_v56 }
 0x258   :  { %v1664_v41 = vadd.f32 %v3061_v17, %v1663_v37 }
 0x259   :  { %v1693_v58 = vsel %vm3069_vm2, 0.0, %v1619_v34 }
 0x25a   :  { %v1708_v59 = vsel %vm3069_vm2, 0.0, %v1664_v41  ;;  %1725 = vst [vmem:[#allocation12 + $0x68] sm:$0xff] %v1693_v58 }
 0x25b   :  { %1740 = vst [vmem:[#allocation12 + $0xe0] sm:$0xff] %v1708_v59 }
 0x25e   :  { %v1621_v60 = vpop.f32.mrf.mxu2 }
 0x25f   :  { %v1666_v26 = vpop.f32.mrf.mxu3  ;;  %v1622_v5 = vadd.f32 %v3061_v17, %v1621_v60 }
 0x260   :  { %v1667_v55 = vadd.f32 %v3061_v17, %v1666_v26 }
 0x261   :  { %v1694_v54 = vsel %vm3069_vm2, 0.0, %v1622_v5 }
 0x262   :  { %v1709_v20 = vsel %vm3069_vm2, 0.0, %v1667_v55  ;;  %1726 = vst [vmem:[#allocation12 + $0x70] sm:$0xff] %v1694_v54 }
 0x263   :  { %1741 = vst [vmem:[#allocation12 + $0xe8] sm:$0xff] %v1709_v20 }
 0x266   :  { %v1624_v61 = vpop.f32.mrf.mxu2 }
 0x267   :  { %v1669_v9 = vpop.f32.mrf.mxu3  ;;  %v1625_v10 = vadd.f32 %v3061_v17, %v1624_v61 }
 0x268   :  { %v1670_v3 = vadd.f32 %v3061_v17, %v1669_v9 }
 0x269   :  { %v1695_v7 = vsel %vm3069_vm2, 0.0, %v1625_v10 }
 0x26a   :  { %v1710_v11 = vsel %vm3069_vm2, 0.0, %v1670_v3  ;;  %1727 = vst [vmem:[#allocation12 + $0x78] sm:$0xff] %v1695_v7 }
 0x26b   :  { %1742 = vst [vmem:[#allocation12 + $0xf0] sm:$0xff] %v1710_v11 }
 0x26e   :  { %v1627_v52 = vpop.f32.mrf.mxu2 }
 0x26f   :  { %v1672_v18 = vpop.f32.mrf.mxu3  ;;  %v1628_v40 = vadd.f32 %v3061_v17, %v1627_v52 }
 0x270   :  { %v1673_v6 = vadd.f32 %v3061_v17, %v1672_v18 }
 0x271   :  { %v1696_v16 = vsel %vm3069_vm2, 0.0, %v1628_v40 }
 0x272   :  { %v1711_v46 = vsel %vm3069_vm2, 0.0, %v1673_v6  ;;  %1728 = vst [vmem:[#allocation12 + $0x80] sm:$0xff] %v1696_v16 }
 0x273   :  { %1743 = vst [vmem:[#allocation12 + $0xf8] sm:$0xff] %v1711_v46 }
 0x276   :  { %v1630_v4 = vpop.f32.mrf.mxu2 }
 0x277   :  { %v1631_v19 = vadd.f32 %v3061_v17, %v1630_v4 }
 0x279   :  { %v1697_v23 = vsel %vm3069_vm2, 0.0, %v1631_v19 }
 0x27a   :  { %1729 = vst [vmem:[#allocation12 + $0x88] sm:$0xff] %v1697_v23 }
 0x27e   :  { %v1633_v24 = vpop.f32.mrf.mxu2 }
 0x27f   :  { %v1634_v36 = vadd.f32 %v3061_v17, %v1633_v24 }
 0x281   :  { %v1698_v25 = vsel %vm3069_vm2, 0.0, %v1634_v36 }
 0x282   :  { %1730 = vst [vmem:[#allocation12 + $0x90] sm:$0xff] %v1698_v25 }
 0x286   :  { %v1636_v50 = vpop.f32.mrf.mxu2 }
 0x287   :  { %v1637_v14 = vadd.f32 %v3061_v17, %v1636_v50 }
 0x289   :  { %v1699_v28 = vsel %vm3069_vm2, 0.0, %v1637_v14 }
 0x28a   :  { %1731 = vst [vmem:[#allocation12 + $0x98] sm:$0xff] %v1699_v28 }
 0x28e   :  { %v1639_v32 = vpop.f32.mrf.mxu2 }
 0x28f   :  { %v1640_v27 = vadd.f32 %v3061_v17, %v1639_v32 }
 0x291   :  { %v1700_v29 = vsel %vm3069_vm2, 0.0, %v1640_v27 }
 0x292   :  { %1732 = vst [vmem:[#allocation12 + $0xa0] sm:$0xff] %v1700_v29 }
 0x296   :  { %v1642_v42 = vpop.f32.mrf.mxu2 }
 0x297   :  { %v1643_v2 = vadd.f32 %v3061_v17, %v1642_v42 }
 0x299   :  { %v1701_v13 = vsel %vm3069_vm2, 0.0, %v1643_v2 }
 0x29a   :  { %1733 = vst [vmem:[#allocation12 + $0xa8] sm:$0xff] %v1701_v13 }
 0x29e   :  { %v1645_v30 = vpop.f32.mrf.mxu2 }
 0x29f   :  { %v1646_v15 = vadd.f32 %v3061_v17, %v1645_v30 }
 0x2a1   :  { %v1702_v35 = vsel %vm3069_vm2, 0.0, %v1646_v15 }
 0x2a2   :  { %1734 = vst [vmem:[#allocation12 + $0xb0] sm:$0xff] %v1702_v35 }
 0x2a6   :  { %v1648_v33 = vpop.f32.mrf.mxu2 }
 0x2a7   :  { %v1649_v44 = vadd.f32 %v3061_v17, %v1648_v33 }
 0x2a9   :  { %v1703_v8 = vsel %vm3069_vm2, 0.0, %v1649_v44 }
 0x2aa   :  { %1735 = vst [vmem:[#allocation12 + $0xb8] sm:$0xff] %v1703_v8 }
 0x2ab   :  { %1756 = dma.vmem_to_hbm [thread:$0]  %s1749_s7, 4096, %s1751_s15, [#allocation6], %s2210_s13, %s2210_s13, %s2211_s14  }
 0x2ac   :  { %2207 = dma.done.wait [#allocation6], 4096  }
 0x2ad   :  { %2208 = vsyncadd [#allocation6], 4294963200 }
 0x2ae   :  { %1761 = vsyncpa [#allocation5], 1 }
 0x2af   :  { %1762 = vsyncpa [#allocation8], 1 }
 0x2b0   :  { %1763 = vsyncpa [#allocation11], 1 }
 0x2b1   :  { %1764 = vsyncpa [#allocation6], 1 }

</bundles_post_ra>
